<compile_context>
chip_gen: v5e
topology: v5e:2x2
jax: 0.10.0
libtpu: 0.0.40
codegen_flags: <defaults>
</compile_context>

<pallas_src>
import math

import jax
import jax.numpy as jnp
from jax.experimental import pallas as pl
from jax.experimental.pallas import tpu as pltpu

# ---- model hyperparameters (small, consistent with the module) ----
B = 2            # batch
L = 8            # sequence length
D = 32           # hidden_dim
NUM_HEADS = 4
HEAD = D // NUM_HEADS
TEMPERATURE = 1.0

_HI = jax.lax.Precision.HIGHEST


# ------------------------- alibi bias (host-side, built once) -------------------------
def _alibi_slopes(heads):
    def pow2_slopes(n):
        start = 2 ** (-2 ** (-(math.log2(n) - 3)))
        ratio = start
        return [start * ratio ** i for i in range(n)]
    if math.log2(heads).is_integer():
        return pow2_slopes(heads)
    closest = 2 ** math.floor(math.log2(heads))
    return (pow2_slopes(closest)
            + pow2_slopes(2 * closest)[0::2][: heads - closest])


def make_alibi_bias(num_heads, seq_len):
    # AlibiPositionalBias(heads=num_heads//2 + (num_heads%2==1), total_heads=num_heads)
    alibi_heads = num_heads // 2 + (num_heads % 2 == 1)
    slopes = jnp.asarray(_alibi_slopes(alibi_heads), dtype=jnp.float32)     # (ah,)
    i_ar = jnp.arange(seq_len)
    j_ar = jnp.arange(seq_len)
    bias = -jnp.abs(j_ar[None, :] - i_ar[:, None]).astype(jnp.float32)      # (L, L)
    bias = slopes[:, None, None] * bias[None, :, :]                         # (ah, L, L)
    bias = jnp.pad(bias, ((0, num_heads - alibi_heads), (0, 0), (0, 0)))    # (H, L, L)
    return bias


# -------------------- one-time parameter layout (hoisted out of forward) --------------------
def prepare_params(weights, in_bias, out_w, out_bias, gamma, alibi_bias):
    """Pack all parameters into two VMEM-friendly slabs.  Runs ONCE at init."""
    d = weights.shape[0]
    nh = gamma.shape[-1]
    hd = d // nh
    l = alibi_bias.shape[-1]

    # Reorder in-proj columns from the module's [head][q|k|v] layout to [q|k|v][head],
    # so the kernel can take Q/K/V as contiguous lane slices of the projection result.
    w_in = weights.reshape(d, nh, 3, hd).transpose(0, 2, 1, 3).reshape(d, 3 * d)
    b_in = in_bias.reshape(nh, 3, hd).transpose(1, 0, 2).reshape(3 * d)

    # Weight + bias slab: (D+1, 4D) = (33, 128) -> exactly one lane-width.
    #   [0:D, 0:3D]  = W_in (reordered)      [0:D, 3D:4D] = W_out
    #   [D,   0:3D]  = b_in (reordered)      [D,   3D:4D] = b_out
    wb = jnp.zeros((d + 1, 4 * d), jnp.float32)
    wb = wb.at[0:d, 0:3 * d].set(w_in)
    wb = wb.at[0:d, 3 * d:4 * d].set(out_w)
    wb = wb.at[d, 0:3 * d].set(b_in)
    wb = wb.at[d, 3 * d:4 * d].set(out_bias.reshape(-1))

    # Per-head constants slab: (H, L+1, L); [:, :L, :] = alibi bias, [:, L, 0] = gamma.
    hc = jnp.zeros((nh, l + 1, l), jnp.float32)
    hc = hc.at[:, 0:l, :].set(alibi_bias)
    hc = hc.at[:, l, 0].set(gamma.reshape(-1))
    return wb, hc


# ------------------------------- Pallas kernel ---------------------------------
def mhsa_kernel(x_ref,     # VMEM (B, L, D)
                adj_ref,   # VMEM (B, 1, L, L)
                wb_ref,    # VMEM (D+1, 4D)   packed {W_in | W_out ; b_in | b_out}
                hc_ref,    # VMEM (H, L+1, L) packed {alibi ; gamma}
                o_ref):    # VMEM (B, L, D)
    b, l, d = x_ref.shape
    nh = hc_ref.shape[0]
    hd = d // nh
    f32 = jnp.float32

    # ---- carve the packed parameter slabs (static slices) ----
    w_in = wb_ref[0:d, 0:3 * d]              # (D, 3D)
    w_out = wb_ref[0:d, 3 * d:4 * d]         # (D, D)
    b_in = wb_ref[d:d + 1, 0:3 * d]          # (1, 3D)
    b_out = wb_ref[d:d + 1, 3 * d:4 * d]     # (1, D)
    alibi = hc_ref[:, 0:l, :]                # (H, L, L)
    gamma = hc_ref[:, l:l + 1, 0:1]          # (H, 1, 1)

    # ---- in-projection: ONE (B*L, D) @ (D, 3D) MXU push ----
    xf = x_ref[...].reshape(b * l, d)
    xp = jnp.dot(xf, w_in, preferred_element_type=f32, precision=_HI) + b_in

    # Q/K/V are contiguous lane slices (columns are [Q | K | V], head-major inside).
    def to_heads(t2d):                       # (B*L, D) -> (B*H, L, hd)
        return t2d.reshape(b, l, nh, hd).transpose(0, 2, 1, 3).reshape(b * nh, l, hd)

    q = to_heads(xp[:, 0:d])
    k = to_heads(xp[:, d:2 * d])
    v = to_heads(xp[:, 2 * d:3 * d])

    # ---- attention core: (B*H)-batched tiny matmuls (L = hd = 8) ----
    scale = 1.0 / (TEMPERATURE * math.sqrt(hd))
    scores = jnp.einsum('pid,pjd->pij', q, k,
                        preferred_element_type=f32, precision=_HI)      # (P, L, L)
    bias = alibi[None] + gamma[None] * adj_ref[...]                     # (B, H, L, L)
    scores = scores * scale + bias.reshape(b * nh, l, l)

    m = jnp.max(scores, axis=-1, keepdims=True)
    e = jnp.exp(scores - m)
    attn = e / jnp.sum(e, axis=-1, keepdims=True)                       # exact softmax

    ctx = jnp.einsum('pij,pjd->pid', attn, v,
                     preferred_element_type=f32, precision=_HI)         # (P, L, hd)

    # ---- out-projection fused with the head concat: ONE (B*L, D) @ (D, D) push ----
    ctx2 = ctx.reshape(b, nh, l, hd).transpose(0, 2, 1, 3).reshape(b * l, d)
    out = jnp.dot(ctx2, w_out, preferred_element_type=f32, precision=_HI) + b_out
    o_ref[...] = out.reshape(b, l, d)


@jax.jit
def mhsa_forward(x, adj, wb, hc):
    """x: (B, L, D), adj: (B, 1, L, L), packed params -> (B, L, D)."""
    b, l, d = x.shape
    vmem = pl.BlockSpec(memory_space=pltpu.MemorySpace.VMEM)   # whole-array, no grid
    return pl.pallas_call(
        mhsa_kernel,
        out_shape=jax.ShapeDtypeStruct((b, l, d), jnp.float32),
        in_specs=[vmem, vmem, vmem, vmem],
        out_specs=vmem,
    )(x, adj, wb, hc)


# ------------------------------ reference (pure JAX) ---------------------------------
def mhsa_reference(x, adj, weights, in_bias, out_w, out_bias, gamma, alibi_bias):
    b, l, d = x.shape
    xp = jnp.dot(x, weights, precision=_HI) + in_bias[None]             # (B, L, 3D)
    xp = xp.reshape(b, l, NUM_HEADS, 3 * HEAD).transpose(0, 2, 1, 3)    # (B, H, L, 3hd)
    q, k, v = jnp.split(xp, 3, axis=3)
    attn = jnp.einsum('bhid,bhjd->bhij', q, k, precision=_HI)
    attn = attn / TEMPERATURE / math.sqrt(HEAD)
    attn = attn + alibi_bias[None]                                      # (1, H, L, L)
    attn = attn + gamma[None, :, None, None] * adj                      # adj (B,1,L,L)
    attn = jax.nn.softmax(attn, axis=-1)
    out = jnp.einsum('bhij,bhjd->bhid', attn, v, precision=_HI)
    out = out.transpose(0, 2, 1, 3).reshape(b, l, d)
    return jnp.dot(out, out_w, precision=_HI) + out_bias[None]


# ------------------------------------ main ---------------------------------------
if __name__ == "__main__":
    key = jax.random.PRNGKey(0)
    k_x, k_adj, k_w, k_ow = jax.random.split(key, 4)

    # inputs
    x = jax.random.normal(k_x, (B, L, D), dtype=jnp.float32)
    adj = jax.random.normal(k_adj, (B, 1, L, L), dtype=jnp.float32)

    # parameters (deterministic init matching the module's __init__)
    std_in = math.sqrt(2.0 / (D + 3 * D))          # xavier_normal_ for (D, 3D)
    std_out = math.sqrt(2.0 / (D + D))             # xavier_normal_ for (D, D)
    weights = jax.random.normal(k_w, (D, 3 * D), dtype=jnp.float32) * std_in
    out_w = jax.random.normal(k_ow, (D, D), dtype=jnp.float32) * std_out
    in_bias = jnp.zeros((1, 3 * D), dtype=jnp.float32)
    out_bias = jnp.zeros((1, D), dtype=jnp.float32)
    gamma = jnp.ones((NUM_HEADS,), dtype=jnp.float32)
    alibi_bias = make_alibi_bias(NUM_HEADS, L)     # (H, L, L)

    # one-time parameter packing/layout (hoisted out of the per-call path)
    wb, hc = prepare_params(weights, in_bias, out_w, out_bias, gamma, alibi_bias)
    wb, hc = jax.block_until_ready((wb, hc))

    out = mhsa_forward(x, adj, wb, hc)
    out = jax.block_until_ready(out)

    ref = mhsa_reference(x, adj, weights, in_bias, out_w, out_bias, gamma, alibi_bias)
    assert jnp.allclose(out, ref, atol=1e-3, rtol=1e-3), "mismatch vs reference"

    print("KERNEL_OK")
</pallas_src>

<mosaic_0001>
module attributes {stable_mosaic.version = 11 : i64} {
  func.func @mhsa_kernel(%arg0: memref<2x8x32xf32, #tpu.memory_space<vmem>>, %arg1: memref<2x1x8x8xf32, #tpu.memory_space<vmem>>, %arg2: memref<33x128xf32, #tpu.memory_space<vmem>>, %arg3: memref<4x9x8xf32, #tpu.memory_space<vmem>>, %arg4: memref<2x8x32xf32, #tpu.memory_space<vmem>>) attributes {dimension_semantics = [], scalar_prefetch = 0 : i64, scratch_operands = 0 : i64, tpu.core_type = #tpu.core_type<tc>} {
    %c0 = arith.constant 0 : index
    %c0_0 = arith.constant 0 : index
    %0 = vector.load %arg2[%c0, %c0_0] : memref<33x128xf32, #tpu.memory_space<vmem>>, vector<32x96xf32>
    %c0_1 = arith.constant 0 : index
    %c96 = arith.constant 96 : index
    %1 = vector.load %arg2[%c0_1, %c96] : memref<33x128xf32, #tpu.memory_space<vmem>>, vector<32x32xf32>
    %c32 = arith.constant 32 : index
    %c0_2 = arith.constant 0 : index
    %2 = vector.load %arg2[%c32, %c0_2] : memref<33x128xf32, #tpu.memory_space<vmem>>, vector<1x96xf32>
    %c32_3 = arith.constant 32 : index
    %c96_4 = arith.constant 96 : index
    %3 = vector.load %arg2[%c32_3, %c96_4] : memref<33x128xf32, #tpu.memory_space<vmem>>, vector<1x32xf32>
    %c0_5 = arith.constant 0 : index
    %c0_6 = arith.constant 0 : index
    %c0_7 = arith.constant 0 : index
    %4 = vector.load %arg3[%c0_5, %c0_6, %c0_7] : memref<4x9x8xf32, #tpu.memory_space<vmem>>, vector<4x8x8xf32>
    %c0_8 = arith.constant 0 : index
    %c8 = arith.constant 8 : index
    %c0_9 = arith.constant 0 : index
    %5 = vector.load %arg3[%c0_8, %c8, %c0_9] : memref<4x9x8xf32, #tpu.memory_space<vmem>>, vector<4x1x1xf32>
    %c0_10 = arith.constant 0 : index
    %c0_11 = arith.constant 0 : index
    %c0_12 = arith.constant 0 : index
    %6 = vector.load %arg0[%c0_10, %c0_11, %c0_12] : memref<2x8x32xf32, #tpu.memory_space<vmem>>, vector<2x8x32xf32>
    %7 = vector.shape_cast %6 : vector<2x8x32xf32> to vector<16x32xf32>
    %cst = arith.constant dense<0.000000e+00> : vector<16x96xf32>
    %8 = tpu.matmul %7, %0, %cst {dimension_numbers = #tpu.dot_dimension_numbers<[1], [0], [0], [1], [0, 0, 1, 1], [], []>, precision = #tpu.contract_precision<fp32>} : vector<16x32xf32>, vector<32x96xf32>, vector<16x96xf32> -> vector<16x96xf32>
    %9 = vector.broadcast %2 : vector<1x96xf32> to vector<16x96xf32>
    %10 = arith.addf %8, %9 : vector<16x96xf32>
    %11 = vector.extract_strided_slice %10 {offsets = [0, 0], sizes = [16, 32], strides = [1, 1]} : vector<16x96xf32> to vector<16x32xf32>
    %12 = vector.shape_cast %11 : vector<16x32xf32> to vector<2x8x4x8xf32>
    %13 = tpu.transpose %12, [0, 2, 1, 3] : vector<2x8x4x8xf32> -> vector<2x4x8x8xf32>
    %14 = vector.shape_cast %13 : vector<2x4x8x8xf32> to vector<8x8x8xf32>
    %15 = vector.extract_strided_slice %10 {offsets = [0, 32], sizes = [16, 32], strides = [1, 1]} : vector<16x96xf32> to vector<16x32xf32>
    %16 = vector.shape_cast %15 : vector<16x32xf32> to vector<2x8x4x8xf32>
    %17 = tpu.transpose %16, [0, 2, 1, 3] : vector<2x8x4x8xf32> -> vector<2x4x8x8xf32>
    %18 = vector.shape_cast %17 : vector<2x4x8x8xf32> to vector<8x8x8xf32>
    %19 = vector.extract_strided_slice %10 {offsets = [0, 64], sizes = [16, 32], strides = [1, 1]} : vector<16x96xf32> to vector<16x32xf32>
    %20 = vector.shape_cast %19 : vector<16x32xf32> to vector<2x8x4x8xf32>
    %21 = tpu.transpose %20, [0, 2, 1, 3] : vector<2x8x4x8xf32> -> vector<2x4x8x8xf32>
    %22 = vector.shape_cast %21 : vector<2x4x8x8xf32> to vector<8x8x8xf32>
    "tpu.trace_start"() <{level = 10 : i32, message = "pid,pjd->pij"}> : () -> ()
    %cst_13 = arith.constant dense<0.000000e+00> : vector<8x8x8xf32>
    %23 = tpu.matmul %14, %18, %cst_13 {dimension_numbers = #tpu.dot_dimension_numbers<[2], [2], [1], [1], [0, 0, 0, 1, 1, 1], [0], [0]>, precision = #tpu.contract_precision<fp32>} : vector<8x8x8xf32>, vector<8x8x8xf32>, vector<8x8x8xf32> -> vector<8x8x8xf32>
    "tpu.trace_stop"() : () -> ()
    %24 = vector.shape_cast %4 : vector<4x8x8xf32> to vector<1x4x8x8xf32>
    %25 = vector.shape_cast %5 : vector<4x1x1xf32> to vector<1x4x1x1xf32>
    %c0_14 = arith.constant 0 : index
    %c0_15 = arith.constant 0 : index
    %c0_16 = arith.constant 0 : index
    %c0_17 = arith.constant 0 : index
    %26 = vector.load %arg1[%c0_14, %c0_15, %c0_16, %c0_17] : memref<2x1x8x8xf32, #tpu.memory_space<vmem>>, vector<2x1x8x8xf32>
    %27 = vector.broadcast %25 : vector<1x4x1x1xf32> to vector<2x4x8x8xf32>
    %28 = vector.broadcast %26 : vector<2x1x8x8xf32> to vector<2x4x8x8xf32>
    %29 = arith.mulf %27, %28 : vector<2x4x8x8xf32>
    %30 = vector.broadcast %24 : vector<1x4x8x8xf32> to vector<2x4x8x8xf32>
    %31 = arith.addf %30, %29 : vector<2x4x8x8xf32>
    %cst_18 = arith.constant 0.353553385 : f32
    %32 = vector.broadcast %cst_18 : f32 to vector<8x8x8xf32>
    %33 = arith.mulf %23, %32 : vector<8x8x8xf32>
    %34 = vector.shape_cast %31 : vector<2x4x8x8xf32> to vector<8x8x8xf32>
    %35 = arith.addf %33, %34 : vector<8x8x8xf32>
    %cst_19 = arith.constant dense<0xFF800000> : vector<8x8xf32>
    %36 = vector.multi_reduction <maximumf>, %35, %cst_19 [2] : vector<8x8x8xf32> to vector<8x8xf32>
    %37 = vector.shape_cast %36 : vector<8x8xf32> to vector<8x8x1xf32>
    %38 = vector.broadcast %37 : vector<8x8x1xf32> to vector<8x8x8xf32>
    %39 = arith.subf %35, %38 : vector<8x8x8xf32>
    %40 = math.exp %39 : vector<8x8x8xf32>
    %cst_20 = arith.constant dense<0.000000e+00> : vector<8x8xf32>
    %41 = vector.multi_reduction <add>, %40, %cst_20 [2] : vector<8x8x8xf32> to vector<8x8xf32>
    %42 = vector.shape_cast %41 : vector<8x8xf32> to vector<8x8x1xf32>
    %43 = vector.broadcast %42 : vector<8x8x1xf32> to vector<8x8x8xf32>
    %44 = arith.divf %40, %43 : vector<8x8x8xf32>
    "tpu.trace_start"() <{level = 10 : i32, message = "pij,pjd->pid"}> : () -> ()
    %cst_21 = arith.constant dense<0.000000e+00> : vector<8x8x8xf32>
    %45 = tpu.matmul %44, %22, %cst_21 {dimension_numbers = #tpu.dot_dimension_numbers<[2], [1], [1], [2], [0, 0, 0, 1, 1, 2], [0], [0]>, precision = #tpu.contract_precision<fp32>} : vector<8x8x8xf32>, vector<8x8x8xf32>, vector<8x8x8xf32> -> vector<8x8x8xf32>
    "tpu.trace_stop"() : () -> ()
    %46 = vector.shape_cast %45 : vector<8x8x8xf32> to vector<2x4x8x8xf32>
    %47 = tpu.transpose %46, [0, 2, 1, 3] : vector<2x4x8x8xf32> -> vector<2x8x4x8xf32>
    %48 = vector.shape_cast %47 : vector<2x8x4x8xf32> to vector<16x32xf32>
    %cst_22 = arith.constant dense<0.000000e+00> : vector<16x32xf32>
    %49 = tpu.matmul %48, %1, %cst_22 {dimension_numbers = #tpu.dot_dimension_numbers<[1], [0], [0], [1], [0, 0, 1, 1], [], []>, precision = #tpu.contract_precision<fp32>} : vector<16x32xf32>, vector<32x32xf32>, vector<16x32xf32> -> vector<16x32xf32>
    %50 = vector.broadcast %3 : vector<1x32xf32> to vector<16x32xf32>
    %51 = arith.addf %49, %50 : vector<16x32xf32>
    %52 = vector.shape_cast %51 : vector<16x32xf32> to vector<2x8x32xf32>
    %c0_23 = arith.constant 0 : index
    %c0_24 = arith.constant 0 : index
    %c0_25 = arith.constant 0 : index
    %53 = vector.load %arg4[%c0_23, %c0_24, %c0_25] : memref<2x8x32xf32, #tpu.memory_space<vmem>>, vector<2x8x32xf32>
    tpu.vector_store %arg4[%c0_23, %c0_24, %c0_25], %52 {strides = array<i32>} : memref<2x8x32xf32, #tpu.memory_space<vmem>>, vector<2x8x32xf32>,
    return
  }
}

</mosaic_0001>

<bundles_post_ra>
// kernel: mhsa_forward.1
= control target key start
LH: loop header
LB: loop body
LE: loop exit
PB: predicated region body
PF: predicated region fallthrough
CT: control target
= control target key end

     0   :  { %vm34_vm0 = vcmask 261120   ;;  %s5207_s0 = inlined_call_operand.vmem [shape: f32[2,8,32], index: 0, kind: input, shape index: {}]   ;;  %s5208_s1 = inlined_call_operand.vmem [shape: f32[2,1,8,8], index: 1, kind: input, shape index: {}]   ;;  %s5209_s2 = inlined_call_operand.vmem [shape: f32[33,128], index: 2, kind: input, shape index: {}]   ;;  %s5210_s3 = inlined_call_operand.vmem [shape: f32[4,9,8], index: 3, kind: input, shape index: {}]   ;;  %s5211_s4 = inlined_call_operand.hbm [shape: f32[2,8,32], index: 4, kind: output, shape index: {}]  }
   0x1   :  { %v21_v0 = vld [vmem:[%s5209_s2 + $0x18] sm:$0xff]  ;;  %v20_v1 = vld [vmem:[%s5209_s2 + $0x10] sm:$0xff]  ;;  %v19_v2 = vld [vmem:[%s5209_s2 + $0x8] sm:$0xff] }
   0x2   :  { %v4291_v3 = vand.u32 4294901760, %v21_v0  ;;  %v4293_v4 = vand.u32 4294901760, %v20_v1  ;;  %v4295_v5 = vand.u32 4294901760, %v19_v2  ;;  %v18_v6 = vld [vmem:[%s5209_s2] sm:$0xff]  ;;  %v32_v7 = vld [vmem:[%s5207_s0 + $0x8] sm:$0xff] }
   0x3   :  { %v31_v8 = vld [vmem:[%s5207_s0] sm:$0xff]  ;;  %v4306_v9 = vand.u32 4294901760, %v18_v6  ;;  %v39_v10 = vsel %vm34_vm0, %v32_v7, 0 }
   0x4   :  { %v36_v11 = vsel %vm34_vm0, %v31_v8, 0  ;;  %4151 = vmatpush.msra.mxu2 %v4291_v3  ;;  %v91_v12 = vsub.f32 %v21_v0, %v4291_v3  ;;  %v4312_v13 = vand.u32 4294901760, %v39_v10  ;;  %v97_v14 = vsub.f32 %v20_v1, %v4293_v4  ;;  %54 = vmatpush.msra.mxu0 %v4291_v3 }
   0x5   :  { %v103_v15 = vsub.f32 %v19_v2, %v4295_v5 }
   0x6   :  { %9 = vsyncpa [#allocation3], 0  ;;  %v109_v16 = vsub.f32 %v18_v6, %v4306_v9  ;;  %v61_v17 = vand.u32 4294901760, %v36_v11  ;;  %4152 = vmatpush.msra.mxu2 %v4293_v4  ;;  %v92_v18 = vand.u32 4294901760, %v91_v12  ;;  %v70_v19 = vsub.f32 %v39_v10, %v4312_v13  ;;  %56 = vmatpush.msra.mxu0 %v4293_v4  ;;  %v4180_v39 = vld [vmem:[%s5209_s2 + $0x20] ss:$0 sm:$0xff] }
   0x7   :  { %v98_v20 = vand.u32 4294901760, %v97_v14  ;;  %v104_v21 = vand.u32 4294901760, %v103_v15  ;;  %s4244_s28 = smov 104   ;;  %s4245_s29 = smov 120   ;;  %vm278_vm1 = vcmask 1047556   ;;  %vm986_vm2 = vcmask 64512  }
   0x8   :  { %v110_v22 = vand.u32 4294901760, %v109_v16  ;;  %v62_v23 = vsub.f32 %v36_v11, %v61_v17  ;;  %4153 = vmatpush.msra.mxu2 %v4295_v5  ;;  %v93_v24 = vsub.f32 %v91_v12, %v92_v18  ;;  %v71_v25 = vand.u32 4294901760, %v70_v19  ;;  %58 = vmatpush.msra.mxu0 %v4295_v5  ;;  %s4246_s30 = smov 96   ;;  %s4247_s5 = smov 112  }
   0x9   :  { %v99_v26 = vsub.f32 %v97_v14, %v98_v20  ;;  %v105_v27 = vsub.f32 %v103_v15, %v104_v21  ;;  %s4248_s6 = smov 64   ;;  %s4252_s9 = smov 16  }
   0xa   :  { %v63_v28 = vand.u32 4294901760, %v62_v23  ;;  %4154 = vmatpush.msra.mxu2 %v4306_v9  ;;  %v94_v29 = vand.u32 4294901760, %v93_v24  ;;  %v72_v30 = vsub.f32 %v70_v19, %v71_v25  ;;  %v111_v32 = vsub.f32 %v109_v16, %v110_v22  ;;  %60 = vmatpush.msra.mxu0 %v4306_v9  ;;  %s4253_s10 = smov 24   ;;  %s4254_s13 = smov 8  }
   0xb   :  { %v100_v31 = vand.u32 4294901760, %v99_v26  ;;  %v106_v35 = vand.u32 4294901760, %v105_v27  ;;  %s4255_s18 = smov [#allocation2]  }
   0xc   :  { %137 = vmatpush.msrb.mxu2 %v91_v12  ;;  %v64_v33 = vsub.f32 %v62_v23, %v63_v28  ;;  %206 = vmatpush.msrb.mxu0 %v92_v18  ;;  %v73_v34 = vand.u32 4294901760, %v72_v30  ;;  %v112_v37 = vand.u32 4294901760, %v111_v32  ;;  %s4137_s19 = sshll.u32 %s4255_s18, 4  ;;  %s4138_s19 = int_to_ptr.vmem [resolvable:$true] %s4137_s19 }
   0xd   :  { %4155 = vmatpush.msra.mxu3 %v94_v29  ;;  %95 = vmatpush.msra.mxu1 %v94_v29 }
   0xe   :  { %140 = vmatpush.msrb.mxu2 %v97_v14  ;;  %v65_v36 = vand.u32 4294901760, %v64_v33  ;;  %210 = vmatpush.msrb.mxu0 %v98_v20 }
   0xf   :  { %74 = vmatmul.f32.vlgmr.msra.gmra.mxu2 %v73_v34  ;;  %4156 = vmatpush.msra.mxu3 %v100_v31 }
  0x10   :  { %143 = vmatpush.msrb.mxu2 %v103_v15  ;;  %101 = vmatpush.msra.mxu1 %v100_v31 }
  0x11   :  { %4157 = vmatpush.msra.mxu3 %v106_v35  ;;  %66 = vmatmul.f32.vlgmr.msra.gmra.mxu0 %v65_v36 }
  0x12   :  { %146 = vmatpush.msrb.mxu2 %v109_v16  ;;  %107 = vmatpush.msra.mxu1 %v106_v35 }
  0x13   :  { %4158 = vmatpush.msra.mxu3 %v112_v37  ;;  %214 = vmatpush.msrb.mxu0 %v104_v21 }
  0x14   :  { %119 = vmatmul.f32.vlgmr.msra.gmra.mxu3 %v4312_v13  ;;  %113 = vmatpush.msra.mxu1 %v112_v37 }
  0x15   :  { %171 = vmatpush.msrb.mxu3 %v4291_v3  ;;  %115 = vmatmul.f32.vlgmr.msra.gmra.mxu1 %v61_v17 }
  0x16   :  { %241 = vmatpush.msrb.mxu1 %v4291_v3  ;;  %218 = vmatpush.msrb.mxu0 %v110_v22 }
  0x17   :  { %149 = vmatmul.f32.vlgmr.msrb.gmra.mxu2 %v62_v23  ;;  %173 = vmatpush.msrb.mxu3 %v4293_v4 }
  0x18   :  { %243 = vmatpush.msrb.mxu1 %v4293_v4  ;;  %v4249_v4 = vmov 1983009808  }
  0x19   :  { %175 = vmatpush.msrb.mxu3 %v4295_v5  ;;  %220 = vmatmul.f32.vlgmr.msrb.gmra.mxu0 %v61_v17 }
  0x1a   :  { %245 = vmatpush.msrb.mxu1 %v4295_v5  ;;  %v283_v5 = vunpack.c.l.s4 %v4249_v4 }
  0x1b   :  { %177 = vmatpush.msrb.mxu3 %v4306_v9 }
  0x1c   :  { %181 = vmatmul.f32.vlgmr.msrb.gmra.mxu3 %v63_v28  ;;  %247 = vmatpush.msrb.mxu1 %v4306_v9  ;;  %v4369_v9 = vunpack.c.0.s8 %v283_v5 }
  0x1d   :  { %249 = vmatmul.f32.vlgmr.msrb.gmra.mxu1 %v61_v17  ;;  %v4250_v17 = vmov 1934713408  }
  0x1e   :  { %v307_v18 = vunpack.c.l.s4 %v4250_v17 }
  0x1f   :  { %154 = vmatmul.f32.gmra.mxu2 %v70_v19 }
  0x20   :  { %v4382_v23 = vunpack.c.0.s8 %v307_v18 }
  0x21   :  { %224 = vmatmul.f32.gmra.mxu0 %v4312_v13 }
  0x24   :  { %187 = vmatmul.f32.gmra.mxu3 %v71_v25 }
  0x25   :  { %253 = vmatmul.f32.gmra.mxu1 %v4312_v13 }
  0x8e   :  { %v67_v38 = vpop.f32.mrf.mxu0 }
  0x8f   :  { %v68_v41 = vadd.f32 %v4180_v39, %v67_v38 }
  0x92   :  { %v75_v40 = vpop.f32.mrf.mxu2  ;;  %v116_v42 = vpop.f32.mrf.mxu1 }
  0x93   :  { %v117_v44 = vadd.f32 %v116_v42, %v68_v41  ;;  %v76_v52 = vadd.f32 %v4180_v39, %v75_v40 }
  0x96   :  { %v221_v48 = vpop.f32.mrf.mxu0 }
  0x97   :  { %v120_v43 = vpop.f32.mrf.mxu3 }
  0x98   :  { %v121_v55 = vadd.f32 %v120_v43, %v76_v52 }
  0x9a   :  { %v150_v45 = vpop.f32.mrf.mxu2  ;;  %v250_v50 = vpop.f32.mrf.mxu1 }
  0x9b   :  { %v151_v46 = vadd.f32 %v150_v45, %v117_v44 }
  0x9e   :  { %v225_v59 = vpop.f32.mrf.mxu0 }
  0x9f   :  { %v182_v47 = vpop.f32.mrf.mxu3 }
  0xa0   :  { %v183_v49 = vadd.f32 %v182_v47, %v151_v46 }
  0xa2   :  { %v222_v51 = vadd.f32 %v221_v48, %v183_v49  ;;  %v155_v54 = vpop.f32.mrf.mxu2  ;;  %v254_v61 = vpop.f32.mrf.mxu1 }
  0xa3   :  { %v156_v57 = vadd.f32 %v155_v54, %v121_v55 }
  0xa4   :  { %v251_v53 = vadd.f32 %v250_v50, %v222_v51 }
  0xa6   :  { %271 = vrot.lane.b32.xlu1 %v251_v53, %s4244_s28  ;;  %259 = vrot.lane.b32.xlu0 %v251_v53, %s4245_s29  ;;  %v280_v6 = vrot.slane %v251_v53, 4 }
  0xa7   :  { %v188_v56 = vpop.f32.mrf.mxu3 }
  0xa8   :  { %v189_v58 = vadd.f32 %v188_v56, %v156_v57 }
  0xaa   :  { %v226_v60 = vadd.f32 %v225_v59, %v189_v58 }
  0xac   :  { %v4340_v62 = vadd.f32 %v254_v61, %v226_v60 }
  0xae   :  { %498 = vrot.lane.b32.xlu1 %v251_v53, %s4246_s30  ;;  %265 = vrot.lane.b32.xlu0 %v251_v53, %s4247_s5 }
  0xb6   :  { %261 = vrot.lane.b32.xlu1 %v4340_v62, %s4245_s29 }
  0xbe   :  { %500 = vrot.lane.b32.xlu1 %v4340_v62, %s4246_s30 }
 0x118   :  { %v4345_v63 = vpop.permute.xlu1 %271  ;;  %v4347_v0 = vpop.permute.xlu0 %259 }
 0x119   :  { %510 = vrot.lane.b32.xlu0 %v4345_v63, %s4246_s30  ;;  %502 = vrot.lane.b32.xlu2 %v4347_v0, %s4246_s30  ;;  %v292_v10 = vrot.slane %v4347_v0, 4  ;;  %v290_v13 = vrot.slane %v4345_v63, 4 }
 0x11b   :  { %v293_v14 = vsel %vm278_vm1, %v4345_v63, %v292_v10  ;;  %v291_v20 = vsel %vm278_vm1, %v290_v13, %v4347_v0 }
 0x11c   :  { %v301_v19 = vperm.slane %v293_v14, %v4369_v9  ;;  %v297_v24 = vperm.slane %v291_v20, %v4369_v9 }
 0x11e   :  { %v314_v26 = vrot.slane %v301_v19, 4  ;;  %v302_v31 = vrot.slane %v297_v24, 4 }
 0x120   :  { %v4353_v1 = vpop.permute.xlu0 %265  ;;  %v4358_v2 = vpop.permute.xlu1 %498 }
 0x121   :  { %273 = vrot.lane.b32.xlu0 %v4340_v62, %s4244_s28  ;;  %506 = vrot.lane.b32.xlu2 %v4353_v1, %s4246_s30  ;;  %v277_v7 = vrot.slane %v4353_v1, 4  ;;  %v281_v8 = vsel %vm278_vm1, %v4353_v1, %v280_v6  ;;  %v524_v54 = vrot.slane %v4358_v2, 4 }
 0x122   :  { %v289_v11 = vperm.slane %v281_v8, %v4369_v9 }
 0x123   :  { %v279_v12 = vsel %vm278_vm1, %v277_v7, %v251_v53 }
 0x124   :  { %v285_v15 = vperm.slane %v279_v12, %v4369_v9  ;;  %v316_v16 = vrot.slane %v289_v11, 4  ;;  %v315_v28 = vsel %vm278_vm1, %v314_v26, %v289_v11 }
 0x125   :  { %v321_v32 = vperm.slane %v315_v28, %v4382_v23 }
 0x126   :  { %v304_v21 = vrot.slane %v285_v15, 4  ;;  %v317_v22 = vsel %vm278_vm1, %v301_v19, %v316_v16  ;;  %v303_v33 = vsel %vm278_vm1, %v302_v31, %v285_v15 }
 0x127   :  { %v325_v25 = vperm.slane %v317_v22, %v4382_v23  ;;  %v309_v37 = vperm.slane %v303_v33, %v4382_v23  ;;  %v330_v38 = vrot.slane %v321_v32, 4 }
 0x128   :  { %v4361_v3 = vpop.permute.xlu1 %261  ;;  %v305_v27 = vsel %vm278_vm1, %v297_v24, %v304_v21 }
 0x129   :  { %267 = vrot.lane.b32.xlu2 %v4340_v62, %s4247_s5  ;;  %v313_v29 = vperm.slane %v305_v27, %v4382_v23  ;;  %v332_v30 = vrot.slane %v325_v25, 4  ;;  %v326_v41 = vrot.slane %v309_v37, 4  ;;  %v331_v42 = vsel %vm278_vm1, 0.0, %v330_v38 }
 0x12b   :  { %v328_v34 = vrot.slane %v313_v29, 4  ;;  %v333_v35 = vsel %vm278_vm1, 0.0, %v332_v30  ;;  %v327_v46 = vsel %vm278_vm1, 0.0, %v326_v41  ;;  %v401_v49 = vsel %vm278_vm1, %v332_v30, %v321_v32 }
 0x12c   :  { %v406_v39 = vrot.slane %v333_v35, 4  ;;  %v4407_v52 = vperm.slane %v401_v49, %v4369_v9 }
 0x12d   :  { %v329_v40 = vsel %vm278_vm1, 0.0, %v328_v34  ;;  %v390_v55 = vsel %vm278_vm1, %v328_v34, %v309_v37 }
 0x12e   :  { %v395_v43 = vrot.slane %v329_v40, 4  ;;  %v407_v44 = vsel %vm278_vm1, %v406_v39, %v331_v42  ;;  %v4420_v60 = vperm.slane %v390_v55, %v4369_v9  ;;  %v426_v42 = vrot.slane %v4407_v52, 4 }
 0x12f   :  { %v4398_v47 = vperm.slane %v407_v44, %v4369_v9 }
 0x130   :  { %v396_v48 = vsel %vm278_vm1, %v395_v43, %v327_v46 }
 0x131   :  { %504 = vrot.lane.b32.xlu2 %v4361_v3, %s4246_s30  ;;  %v4403_v50 = vperm.slane %v396_v48, %v4369_v9  ;;  %v424_v51 = vrot.slane %v4398_v47, 4 }
 0x133   :  { %v412_v57 = vrot.slane %v4403_v50, 4  ;;  %v425_v58 = vsel %vm278_vm1, %v424_v51, %v4407_v52 }
 0x134   :  { %v4425_v4 = vperm.slane %v425_v58, %v4382_v23 }
 0x135   :  { %v413_v6 = vsel %vm278_vm1, %v412_v57, %v4420_v60  ;;  %v414_v57 = vrot.slane %v4420_v60, 4 }
 0x136   :  { %v4433_v13 = vperm.slane %v413_v6, %v4382_v23 }
 0x139   :  { %742 = vrot.lane.b32.xlu2 %v251_v53, %s4248_s6 }
 0x173   :  { %v503_v36 = vpop.permute.xlu2 %502 }
 0x174   :  { %v536_v7 = vrot.slane %v503_v36, 4 }
 0x17b   :  { %v507_v45 = vpop.permute.xlu2 %506 }
 0x17c   :  { %v522_v56 = vrot.slane %v507_v45, 4  ;;  %v525_v59 = vsel %vm278_vm1, %v507_v45, %v524_v54 }
 0x17d   :  { %v533_v5 = vperm.slane %v525_v59, %v4369_v9 }
 0x17e   :  { %v523_v61 = vsel %vm278_vm1, %v522_v56, %v4358_v2  ;;  %v436_v2 = vrot.slane %v4425_v4, 4 }
 0x17f   :  { %v529_v8 = vperm.slane %v523_v61, %v4369_v9  ;;  %v560_v14 = vrot.slane %v533_v5, 4 }
 0x180   :  { %v437_v22 = vsel %vm278_vm1, %v436_v2, %v4433_v13 }
 0x181   :  { %v548_v17 = vrot.slane %v529_v8, 4  ;;  %v988_v32 = vsel %vm986_vm2, %v437_v22, 0 }
 0x182   :  { %v4460_v45 = vand.u32 4294901760, %v988_v32 }
 0x183   :  { %v4409_v53 = vpop.permute.xlu2 %267 }
 0x184   :  { %508 = vrot.lane.b32.xlu0 %v4409_v53, %s4246_s30  ;;  %v4471_v61 = vsub.f32 %v988_v32, %v4460_v45 }
 0x186   :  { %v1012_v2 = vand.u32 4294901760, %v4471_v61 }
 0x18b   :  { %v511_v10 = vpop.permute.xlu0 %510 }
 0x18c   :  { %v534_v11 = vrot.slane %v511_v10, 4  ;;  %v537_v12 = vsel %vm278_vm1, %v511_v10, %v536_v7 }
 0x18d   :  { %v545_v15 = vperm.slane %v537_v12, %v4369_v9 }
 0x18e   :  { %v535_v16 = vsel %vm278_vm1, %v534_v11, %v503_v36 }
 0x18f   :  { %v541_v18 = vperm.slane %v535_v16, %v4369_v9  ;;  %v558_v19 = vrot.slane %v545_v15, 4  ;;  %v561_v20 = vsel %vm278_vm1, %v545_v15, %v560_v14  ;;  %v438_v14 = vrot.slane %v4433_v13, 4 }
 0x190   :  { %v569_v21 = vperm.slane %v561_v20, %v4382_v23  ;;  %v1013_v13 = vsub.f32 %v4471_v61, %v1012_v2 }
 0x191   :  { %v546_v24 = vrot.slane %v541_v18, 4  ;;  %v549_v25 = vsel %vm278_vm1, %v541_v18, %v548_v17  ;;  %v559_v26 = vsel %vm278_vm1, %v558_v19, %v533_v5  ;;  %v427_v5 = vsel %vm278_vm1, %v4398_v47, %v426_v42 }
 0x192   :  { %v557_v27 = vperm.slane %v549_v25, %v4382_v23  ;;  %v565_v28 = vperm.slane %v559_v26, %v4382_v23  ;;  %v576_v29 = vrot.slane %v569_v21, 4  ;;  %v4480_v12 = vperm.slane %v427_v5, %v4382_v23 }
 0x193   :  { %v547_v30 = vsel %vm278_vm1, %v546_v24, %v529_v8  ;;  %v4448_v31 = vpop.permute.xlu0 %273  ;;  %v415_v47 = vsel %vm278_vm1, %v4403_v50, %v414_v57  ;;  %v439_v50 = vsel %vm278_vm1, %v4425_v4, %v438_v14 }
 0x194   :  { %v553_v33 = vperm.slane %v547_v30, %v4382_v23  ;;  %v572_v34 = vrot.slane %v557_v27, 4  ;;  %v574_v35 = vrot.slane %v565_v28, 4  ;;  %v577_v36 = vsel %vm278_vm1, 0.0, %v576_v29  ;;  %512 = vrot.lane.b32.xlu1 %v4448_v31, %s4246_s30  ;;  %s4251_s30 = smov 32  }
 0x195   :  { %v645_v37 = vsel %vm278_vm1, %v576_v29, %v565_v28  ;;  %v650_v38 = vrot.slane %v577_v36, 4  ;;  %v4490_v19 = vperm.slane %v415_v47, %v4382_v23  ;;  %v440_v20 = vrot.slane %v4480_v12, 4 }
 0x196   :  { %v570_v39 = vrot.slane %v553_v33, 4  ;;  %v573_v40 = vsel %vm278_vm1, 0.0, %v572_v34  ;;  %v575_v41 = vsel %vm278_vm1, 0.0, %v574_v35  ;;  %v634_v48 = vsel %vm278_vm1, %v572_v34, %v553_v33 }
 0x197   :  { %v639_v43 = vrot.slane %v573_v40, 4  ;;  %v651_v44 = vsel %vm278_vm1, %v650_v38, %v575_v41  ;;  %v649_v49 = vperm.slane %v645_v37, %v4369_v9  ;;  %v638_v52 = vperm.slane %v634_v48, %v4369_v9 }
 0x198   :  { %v571_v46 = vsel %vm278_vm1, 0.0, %v570_v39  ;;  %v655_v51 = vperm.slane %v651_v44, %v4369_v9  ;;  %v1140_v32 = vsel %vm986_vm2, %v439_v50, 0  ;;  %v441_v33 = vsel %vm278_vm1, %v440_v20, %v4490_v19 }
 0x199   :  { %v640_v54 = vsel %vm278_vm1, %v639_v43, %v571_v46  ;;  %v670_v58 = vrot.slane %v649_v49, 4  ;;  %v658_v10 = vrot.slane %v638_v52, 4  ;;  %v1014_v36 = vand.u32 4294901760, %v1013_v13 }
 0x19a   :  { %v644_v55 = vperm.slane %v640_v54, %v4369_v9  ;;  %v668_v56 = vrot.slane %v655_v51, 4  ;;  %v4508_v39 = vand.u32 4294901760, %v1140_v32  ;;  %v1292_v40 = vsel %vm986_vm2, %v441_v33, 0 }
 0x19b   :  { %v671_v60 = vsel %vm278_vm1, %v655_v51, %v670_v58  ;;  %v1314_v46 = vand.u32 4294901760, %v1292_v40  ;;  %v334_v13 = vrot.slane %v4409_v53, 4 }
 0x19c   :  { %v656_v59 = vrot.slane %v644_v55, 4  ;;  %v669_v6 = vsel %vm278_vm1, %v668_v56, %v649_v49  ;;  %v659_v17 = vsel %vm278_vm1, %v644_v55, %v658_v10  ;;  %v679_v18 = vperm.slane %v671_v60, %v4382_v23 }
 0x19d   :  { %v675_v8 = vperm.slane %v669_v6, %v4382_v23  ;;  %v667_v26 = vperm.slane %v659_v17, %v4382_v23  ;;  %v1163_v49 = vsub.f32 %v1140_v32, %v4508_v39 }
 0x19e   :  { %v657_v7 = vsel %vm278_vm1, %v656_v59, %v638_v52  ;;  %v684_v27 = vrot.slane %v679_v18, 4  ;;  %v1315_v52 = vsub.f32 %v1292_v40, %v1314_v46 }
 0x19f   :  { %v663_v11 = vperm.slane %v657_v7, %v4382_v23  ;;  %v680_v15 = vrot.slane %v675_v8, 4  ;;  %v686_v55 = vrot.slane %v667_v26, 4  ;;  %v1164_v57 = vand.u32 4294901760, %v1163_v49 }
 0x1a0   :  { %v685_v30 = vsel %vm278_vm1, %v684_v27, %v667_v26  ;;  %v1316_v5 = vand.u32 4294901760, %v1315_v52  ;;  %v335_v27 = vsel %vm278_vm1, %v334_v13, %v4340_v62 }
 0x1a1   :  { %v682_v16 = vrot.slane %v663_v11, 4  ;;  %v681_v21 = vsel %vm278_vm1, %v680_v15, %v663_v11  ;;  %v1295_v35 = vsel %vm986_vm2, %v685_v30, 0  ;;  %v687_v59 = vsel %vm278_vm1, %v679_v18, %v686_v55 }
 0x1a2   :  { %v991_v24 = vsel %vm986_vm2, %v681_v21, 0  ;;  %v1312_v37 = vand.u32 4294901760, %v1295_v35  ;;  %v1165_v6 = vsub.f32 %v1163_v49, %v1164_v57  ;;  %v1447_v7 = vsel %vm986_vm2, %v687_v59, 0  ;;  %v27_v59 = vld [vmem:[%s5210_s3 + $0x8] sm:$0x1] }
 0x1a3   :  { %v683_v22 = vsel %vm278_vm1, %v675_v8, %v682_v16  ;;  %v1008_v28 = vand.u32 4294901760, %v991_v24  ;;  %v442_v8 = vrot.slane %v4490_v19, 4  ;;  %v1317_v10 = vsub.f32 %v1315_v52, %v1316_v5  ;;  %4159 = vpush %v27_v59 }
 0x1a4   :  { %v1143_v25 = vsel %vm986_vm2, %v683_v22, 0  ;;  %v1339_v41 = vsub.f32 %v1295_v35, %v1312_v37  ;;  %v1166_v11 = vand.u32 4294901760, %v1165_v6  ;;  %v336_v21 = vrot.slane %v4340_v62, 4 }
 0x1a5   :  { %v1160_v29 = vand.u32 4294901760, %v1143_v25  ;;  %1009 = vmatpush.xpose.msra.mxu2 %v1008_v28  ;;  %1133 = vmatpush.xpose.msra.mxu1 %v1008_v28  ;;  %v1035_v34 = vsub.f32 %v991_v24, %v1008_v28  ;;  %v443_v60 = vsel %vm278_vm1, %v4480_v12, %v442_v8  ;;  %v1318_v14 = vand.u32 4294901760, %v1317_v10 }
 0x1a6   :  { %v1340_v44 = vand.u32 4294901760, %v1339_v41  ;;  %v1444_v15 = vsel %vm986_vm2, %v443_v60, 0  ;;  %v348_v22 = vrot.slane %v4361_v3, 4  ;;  %v337_v50 = vsel %vm278_vm1, %v4409_v53, %v336_v21 }
 0x1a7   :  { %v1187_v4 = vsub.f32 %v1143_v25, %v1160_v29  ;;  %v1036_v38 = vand.u32 4294901760, %v1035_v34  ;;  %v1466_v17 = vand.u32 4294901760, %v1444_v15  ;;  %v346_v24 = vrot.slane %v4448_v31, 4 }
 0x1a8   :  { %1015 = vmatmul.f32.vlgmr.msra.gmra.mxu2 %v1014_v36  ;;  %1135 = vmatmul.f32.vlgmr.msra.gmra.mxu1 %v4460_v45  ;;  %v1341_v51 = vsub.f32 %v1339_v41, %v1340_v44  ;;  %v349_v25 = vsel %vm278_vm1, %v4448_v31, %v348_v22  ;;  %v345_v26 = vperm.slane %v337_v50, %v4369_v9 }
 0x1a9   :  { %1237 = vmatpush.xpose.msrb.mxu1 %v1160_v29  ;;  %1062 = vmatpush.xpose.msrb.mxu2 %v1035_v34  ;;  %v1037_v42 = vsub.f32 %v1035_v34, %v1036_v38  ;;  %v1188_v43 = vand.u32 4294901760, %v1187_v4  ;;  %v1467_v12 = vsub.f32 %v1444_v15, %v1466_v17  ;;  %v341_v30 = vperm.slane %v335_v27, %v4369_v9 }
 0x1aa   :  { %1111 = vmatpush.xpose.msra.mxu0 %v1036_v38  ;;  %v1342_v56 = vand.u32 4294901760, %v1341_v51  ;;  %v372_v32 = vrot.slane %v345_v26, 4 }
 0x1ab   :  { %v1038_v48 = vand.u32 4294901760, %v1037_v42  ;;  %v1189_v54 = vsub.f32 %v1187_v4, %v1188_v43  ;;  %v1468_v18 = vand.u32 4294901760, %v1467_v12  ;;  %v360_v35 = vrot.slane %v341_v30, 4 }
 0x1ad   :  { %1161 = vmatpush.xpose.msra.mxu2 %v1160_v29  ;;  %1113 = vmatmul.f32.vlgmr.msra.gmra.mxu0 %v4460_v45  ;;  %v1190_v58 = vand.u32 4294901760, %v1189_v54  ;;  %v1469_v19 = vsub.f32 %v1467_v12, %v1468_v18 }
 0x1ae   :  { %1214 = vmatpush.xpose.msrb.mxu0 %v1187_v4  ;;  %1039 = vmatpush.xpose.msra.mxu3 %v1038_v48 }
 0x1af   :  { %1343 = vmatpush.xpose.msra.mxu1 %v1342_v56  ;;  %v1470_v20 = vand.u32 4294901760, %v1469_v19  ;;  %v505_v19 = vpop.permute.xlu2 %504 }
 0x1b0   :  { %1065 = vmatmul.f32.vlgmr.msrb.gmra.mxu2 %v4471_v61  ;;  %1241 = vmatmul.f32.vlgmr.msrb.gmra.mxu1 %v1164_v57  ;;  %v592_v13 = vrot.slane %v505_v19, 4 }
 0x1b1   :  { %1041 = vmatmul.f32.vlgmr.msra.gmra.mxu3 %v4460_v45  ;;  %1263 = vmatpush.xpose.msrb.mxu2 %v1188_v43  ;;  %v1464_v45 = vand.u32 4294901760, %v1447_v7 }
 0x1b2   :  { %1313 = vmatpush.xpose.msra.mxu0 %v1312_v37  ;;  %1085 = vmatpush.xpose.msrb.mxu3 %v1008_v28  ;;  %v357_v28 = vperm.slane %v349_v25, %v4369_v9 }
 0x1b3   :  { %1437 = vmatpush.xpose.msrb.mxu1 %v1312_v37  ;;  %v1491_v47 = vsub.f32 %v1447_v7, %v1464_v45 }
 0x1b4   :  { %v370_v34 = vrot.slane %v357_v28, 4  ;;  %v373_v4 = vsel %vm278_vm1, %v357_v28, %v372_v32  ;;  %v29_v32 = vld [vmem:[%s5210_s3 + $0x28] sm:$0x1] }
 0x1b5   :  { %1217 = vmatmul.f32.vlgmr.msrb.gmra.mxu0 %v1163_v49  ;;  %v1492_v16 = vand.u32 4294901760, %v1491_v47  ;;  %v381_v36 = vperm.slane %v373_v4, %v4382_v23 }
 0x1b6   :  { %1191 = vmatpush.xpose.msra.mxu3 %v1190_v58  ;;  %1415 = vmatpush.xpose.msrb.mxu0 %v1340_v44 }
 0x1b7   :  { %v1493_v61 = vsub.f32 %v1491_v47, %v1492_v16  ;;  %v388_v42 = vrot.slane %v381_v36, 4 }
 0x1b8   :  { %1167 = vmatmul.f32.vlgmr.msra.gmra.mxu2 %v1166_v11  ;;  %1345 = vmatmul.f32.vlgmr.msra.gmra.mxu1 %v1314_v46 }
 0x1b9   :  { %1089 = vmatmul.f32.vlgmr.msrb.gmra.mxu3 %v1012_v2  ;;  %1366 = vmatpush.xpose.msra.mxu2 %v1339_v41  ;;  %v1494_v2 = vand.u32 4294901760, %v1493_v61  ;;  %v389_v49 = vsel %vm278_vm1, 0.0, %v388_v42 }
 0x1ba   :  { %1285 = vmatpush.xpose.msrb.mxu3 %v1160_v29  ;;  %1541 = vmatpush.xpose.msra.mxu1 %v1464_v45  ;;  %v347_v29 = vsel %vm278_vm1, %v346_v24, %v4361_v3  ;;  %v460_v51 = vrot.slane %v389_v49, 4 }
 0x1bb   :  { %v353_v33 = vperm.slane %v347_v29, %v4369_v9 }
 0x1bd   :  { %1319 = vmatmul.f32.vlgmr.msra.gmra.mxu0 %v1318_v14  ;;  %v361_v38 = vsel %vm278_vm1, %v353_v33, %v360_v35 }
 0x1be   :  { %1518 = vmatpush.xpose.msra.mxu0 %v1491_v47  ;;  %v369_v40 = vperm.slane %v361_v38, %v4382_v23 }
 0x1c0   :  { %1265 = vmatmul.f32.vlgmr.msrb.gmra.mxu2 %v4508_v39  ;;  %1439 = vmatmul.f32.vlgmr.msrb.gmra.mxu1 %v1314_v46 }
 0x1c1   :  { %1193 = vmatmul.f32.vlgmr.msra.gmra.mxu3 %v4508_v39  ;;  %1465 = vmatpush.xpose.msrb.mxu2 %v1464_v45 }
 0x1c2   :  { %1389 = vmatpush.xpose.msra.mxu3 %v1312_v37  ;;  %v358_v37 = vrot.slane %v353_v33, 4 }
 0x1c4   :  { %v359_v43 = vsel %vm278_vm1, %v358_v37, %v341_v30 }
 0x1c5   :  { %1417 = vmatmul.f32.vlgmr.msrb.gmra.mxu0 %v1314_v46  ;;  %v365_v44 = vperm.slane %v359_v43, %v4382_v23  ;;  %v384_v46 = vrot.slane %v369_v40, 4 }
 0x1c7   :  { %v382_v54 = vrot.slane %v365_v44, 4  ;;  %v385_v55 = vsel %vm278_vm1, 0.0, %v384_v46  ;;  %v444_v47 = vsel %vm278_vm1, %v384_v46, %v365_v44 }
 0x1c8   :  { %1369 = vmatmul.f32.vlgmr.msra.gmra.mxu2 %v1315_v52  ;;  %1545 = vmatmul.f32.vlgmr.msra.gmra.mxu1 %v1468_v18  ;;  %v449_v52 = vrot.slane %v385_v55, 4 }
 0x1c9   :  { %1287 = vmatmul.f32.vlgmr.msrb.gmra.mxu3 %v4508_v39  ;;  %1567 = vmatpush.xpose.msra.mxu2 %v1492_v16  ;;  %v371_v39 = vsel %vm278_vm1, %v370_v34, %v345_v26  ;;  %v383_v58 = vsel %vm278_vm1, 0.0, %v382_v54 }
 0x1ca   :  { %1495 = vmatpush.xpose.msrb.mxu3 %v1494_v2  ;;  %v377_v41 = vperm.slane %v371_v39, %v4382_v23  ;;  %v450_v7 = vsel %vm278_vm1, %v449_v52, %v383_v58 }
 0x1cb   :  { %v4568_v10 = vperm.slane %v450_v7, %v4369_v9 }
 0x1cc   :  { %v386_v48 = vrot.slane %v377_v41, 4  ;;  %v455_v8 = vsel %vm278_vm1, %v388_v42, %v377_v41 }
 0x1cd   :  { %1521 = vmatmul.f32.vlgmr.msra.gmra.mxu0 %v1467_v12  ;;  %v4572_v60 = vperm.slane %v455_v8, %v4369_v9  ;;  %v466_v15 = vrot.slane %v4568_v10, 4  ;;  %v4579_v12 = vperm.slane %v444_v47, %v4369_v9 }
 0x1ce   :  { %v387_v56 = vsel %vm278_vm1, 0.0, %v386_v48 }
 0x1cf   :  { %v461_v57 = vsel %vm278_vm1, %v460_v51, %v387_v56  ;;  %v480_v48 = vrot.slane %v4572_v60, 4 }
 0x1d0   :  { %1471 = vmatmul.f32.vlgmr.msrb.gmra.mxu2 %v1470_v20  ;;  %v4563_v6 = vperm.slane %v461_v57, %v4369_v9  ;;  %v467_v20 = vsel %vm278_vm1, %v466_v15, %v4579_v12 }
 0x1d1   :  { %1393 = vmatmul.f32.vlgmr.msra.gmra.mxu3 %v1316_v5  ;;  %v28_v5 = vld [vmem:[%s5210_s3 + $0x18] sm:$0x1]  ;;  %v473_v50 = vperm.slane %v467_v20, %v4382_v23 }
 0x1d2   :  { %1589 = vmatpush.xpose.msra.mxu3 %v1464_v45  ;;  %4161 = vpush %v28_v5  ;;  %v478_v11 = vrot.slane %v4563_v6, 4  ;;  %v501_v45 = vpop.permute.xlu1 %500 }
 0x1d3   :  { %4163 = vpush %v29_v32  ;;  %v492_v59 = vrot.slane %v473_v50, 4 }
 0x1d4   :  { %v479_v16 = vsel %vm278_vm1, %v478_v11, %v4572_v60  ;;  %s4671_s17 = spop %4159 }
 0x1d5   :  { %v485_v18 = vperm.slane %v479_v16, %v4382_v23 }
 0x1d7   :  { %v490_v24 = vrot.slane %v485_v18, 4 }
 0x1d8   :  { %1569 = vmatmul.f32.vlgmr.msra.gmra.mxu2 %v1466_v17 }
 0x1d9   :  { %1497 = vmatmul.f32.vlgmr.msrb.gmra.mxu3 %v1466_v17  ;;  %v491_v34 = vsel %vm278_vm1, %v490_v24, %v473_v50  ;;  %v468_v24 = vrot.slane %v4579_v12, 4 }
 0x1da   :  { %v1596_v46 = vsel %vm986_vm2, %v491_v34, 0 }
 0x1db   :  { %v4609_v58 = vand.u32 4294901760, %v1596_v46 }
 0x1e1   :  { %1591 = vmatmul.f32.vlgmr.msra.gmra.mxu3 %v1466_v17  ;;  %v580_v17 = vrot.slane %v501_v45, 4 }
 0x1f6   :  { %v509_v14 = vpop.permute.xlu0 %508 }
 0x1f7   :  { %v578_v61 = vrot.slane %v509_v14, 4  ;;  %v581_v2 = vsel %vm278_vm1, %v509_v14, %v580_v17 }
 0x1f8   :  { %v589_v22 = vperm.slane %v581_v2, %v4369_v9 }
 0x1f9   :  { %v579_v21 = vsel %vm278_vm1, %v578_v61, %v501_v45 }
 0x1fa   :  { %v585_v25 = vperm.slane %v579_v21, %v4369_v9  ;;  %v616_v29 = vrot.slane %v589_v22, 4 }
 0x1fc   :  { %v604_v4 = vrot.slane %v585_v25, 4 }
 0x203   :  { %s4693_s20 = spop %4161 }
 0x204   :  { %s4728_s23 = spop %4163 }
 0x206   :  { %v513_v26 = vpop.permute.xlu1 %512 }
 0x207   :  { %v590_v27 = vrot.slane %v513_v26, 4  ;;  %v593_v28 = vsel %vm278_vm1, %v513_v26, %v592_v13  ;;  %v493_v13 = vsel %vm278_vm1, %v485_v18, %v492_v59 }
 0x208   :  { %v601_v30 = vperm.slane %v593_v28, %v4369_v9  ;;  %v1748_v18 = vsel %vm986_vm2, %v493_v13, 0 }
 0x209   :  { %v591_v33 = vsel %vm278_vm1, %v590_v27, %v505_v19  ;;  %v30_v19 = vld [vmem:[%s5210_s3 + $0x38] sm:$0x1] }
 0x20a   :  { %v597_v35 = vperm.slane %v591_v33, %v4369_v9  ;;  %v614_v36 = vrot.slane %v601_v30, 4  ;;  %v617_v37 = vsel %vm278_vm1, %v601_v30, %v616_v29  ;;  %4165 = vpush %v30_v19 }
 0x20b   :  { %v625_v38 = vperm.slane %v617_v37, %v4382_v23 }
 0x20c   :  { %v602_v39 = vrot.slane %v597_v35, 4  ;;  %v605_v40 = vsel %vm278_vm1, %v597_v35, %v604_v4  ;;  %v615_v41 = vsel %vm278_vm1, %v614_v36, %v589_v22  ;;  %v1619_v22 = vsub.f32 %v1596_v46, %v4609_v58 }
 0x20d   :  { %v613_v42 = vperm.slane %v605_v40, %v4382_v23  ;;  %v621_v43 = vperm.slane %v615_v41, %v4382_v23  ;;  %v632_v44 = vrot.slane %v625_v38, 4  ;;  %v4641_v36 = vand.u32 4294901760, %v1748_v18 }
 0x20e   :  { %v603_v49 = vsel %vm278_vm1, %v602_v39, %v585_v25  ;;  %v481_v25 = vsel %vm278_vm1, %v4563_v6, %v480_v48  ;;  %v1620_v34 = vand.u32 4294901760, %v1619_v22  ;;  %v469_v38 = vsel %vm278_vm1, %v4568_v10, %v468_v24  ;;  %v4688_v24 = vld [vmem:[%s5210_s3] sm:$0xff] }
 0x20f   :  { %v609_v51 = vperm.slane %v603_v49, %v4382_v23  ;;  %v628_v54 = vrot.slane %v613_v42, 4  ;;  %v630_v55 = vrot.slane %v621_v43, 4  ;;  %v633_v56 = vsel %vm278_vm1, 0.0, %v632_v44 }
 0x210   :  { %v699_v52 = vsel %vm278_vm1, %v632_v44, %v621_v43  ;;  %v704_v57 = vrot.slane %v633_v56, 4  ;;  %v4639_v35 = vperm.slane %v481_v25, %v4382_v23  ;;  %v1621_v43 = vsub.f32 %v1619_v22, %v1620_v34 }
 0x211   :  { %v626_v5 = vrot.slane %v609_v51, 4  ;;  %v629_v7 = vsel %vm278_vm1, 0.0, %v628_v54  ;;  %v631_v8 = vsel %vm278_vm1, 0.0, %v630_v55  ;;  %v688_v11 = vsel %vm278_vm1, %v628_v54, %v609_v51 }
 0x212   :  { %v692_v45 = vperm.slane %v688_v11, %v4369_v9  ;;  %v693_v60 = vrot.slane %v629_v7, 4  ;;  %v703_v14 = vperm.slane %v699_v52, %v4369_v9  ;;  %v705_v47 = vsel %vm278_vm1, %v704_v57, %v631_v8 }
 0x213   :  { %v627_v15 = vsel %vm278_vm1, 0.0, %v626_v5  ;;  %v709_v16 = vperm.slane %v705_v47, %v4369_v9  ;;  %v477_v48 = vperm.slane %v469_v38, %v4382_v23  ;;  %v494_v49 = vrot.slane %v4639_v35, 4 }
 0x214   :  { %v694_v17 = vsel %vm278_vm1, %v693_v60, %v627_v15  ;;  %v724_v61 = vrot.slane %v703_v14, 4  ;;  %v712_v2 = vrot.slane %v692_v45, 4  ;;  %v4654_v10 = vsub.f32 %v1748_v18, %v4641_v36  ;;  %v4667_v15 = vld [vmem:[%s5208_s1 + $0x8] sm:$0xff] }
 0x215   :  { %v698_v20 = vperm.slane %v694_v17, %v4369_v9  ;;  %v722_v21 = vrot.slane %v709_v16, 4  ;;  %v1622_v57 = vand.u32 4294901760, %v1621_v43  ;;  %v496_v25 = vrot.slane %v477_v48, 4 }
 0x216   :  { %v725_v50 = vsel %vm278_vm1, %v709_v16, %v724_v61  ;;  %v1772_v11 = vand.u32 4294901760, %v4654_v10  ;;  %v2211_v18 = vstv %s4693_s20  ;;  %s4256_s20 = smov 128  }
 0x217   :  { %v710_v26 = vrot.slane %v698_v20, 4  ;;  %v723_v27 = vsel %vm278_vm1, %v722_v21, %v703_v14  ;;  %v713_v28 = vsel %vm278_vm1, %v698_v20, %v712_v2  ;;  %v733_v29 = vperm.slane %v725_v50, %v4382_v23 }
 0x218   :  { %v729_v30 = vperm.slane %v723_v27, %v4382_v23  ;;  %v721_v32 = vperm.slane %v713_v28, %v4382_v23  ;;  %v1773_v19 = vsub.f32 %v4654_v10, %v1772_v11  ;;  %v2207_v20 = vstv %s4671_s17  ;;  %s4139_s17 = sshll.u32 %s5211_s4, 4  ;;  %s4140_s17 = int_to_ptr.hbm [resolvable:$true] %s4139_s17 }
 0x219   :  { %v711_v33 = vsel %vm278_vm1, %v710_v26, %v692_v45  ;;  %v738_v12 = vrot.slane %v733_v29, 4  ;;  %v495_v45 = vsel %vm278_vm1, %v494_v49, %v477_v48 }
 0x21a   :  { %v717_v4 = vperm.slane %v711_v33, %v4382_v23  ;;  %v734_v6 = vrot.slane %v729_v30, 4  ;;  %v740_v37 = vrot.slane %v721_v32, 4  ;;  %v1900_v2 = vsel %vm986_vm2, %v495_v45, 0 }
 0x21b   :  { %v739_v41 = vsel %vm278_vm1, %v738_v12, %v721_v32  ;;  %v4683_v50 = vand.u32 4294901760, %v1900_v2  ;;  %v1774_v28 = vand.u32 4294901760, %v1773_v19  ;;  %v497_v32 = vsel %vm278_vm1, %v4639_v35, %v496_v25 }
 0x21c   :  { %v735_v39 = vsel %vm278_vm1, %v734_v6, %v717_v4  ;;  %v736_v40 = vrot.slane %v717_v4, 4  ;;  %v1903_v54 = vsel %vm986_vm2, %v739_v41, 0  ;;  %v741_v55 = vsel %vm278_vm1, %v733_v29, %v740_v37  ;;  %v4711_v4 = vld [vmem:[%s5210_s3 + $0x10] sm:$0xff] }
 0x21d   :  { %v1599_v42 = vsel %vm986_vm2, %v735_v39, 0  ;;  %v4657_v7 = vand.u32 4294901760, %v1903_v54  ;;  %v2055_v8 = vsel %vm986_vm2, %v741_v55, 0  ;;  %v2226_v12 = vmul.f32 %v2211_v18, %v4667_v15  ;;  %v4739_v55 = vld [vmem:[%s5208_s1] sm:$0xff] }
 0x21e   :  { %v1616_v44 = vand.u32 4294901760, %v1599_v42  ;;  %v737_v46 = vsel %vm278_vm1, %v729_v30, %v736_v40  ;;  %v4662_v47 = vand.u32 4294901760, %v2055_v8  ;;  %v1923_v30 = vsub.f32 %v1900_v2, %v4683_v50 }
 0x21f   :  { %v1751_v51 = vsel %vm986_vm2, %v737_v46, 0  ;;  %v1947_v61 = vsub.f32 %v1903_v54, %v4657_v7  ;;  %v2052_v6 = vsel %vm986_vm2, %v497_v32, 0  ;;  %v4715_v35 = vadd.f32 %v2226_v12, %v4711_v4 }
 0x220   :  { %1617 = vmatpush.xpose.msrb.mxu0 %v1616_v44  ;;  %1693 = vmatpush.xpose.msrb.mxu3 %v1616_v44  ;;  %v1643_v56 = vsub.f32 %v1599_v42, %v1616_v44  ;;  %v1768_v52 = vand.u32 4294901760, %v1751_v51  ;;  %v4681_v13 = vsub.f32 %v2055_v8, %v4662_v47  ;;  %v1924_v38 = vand.u32 4294901760, %v1923_v30 }
 0x221   :  { %v1948_v26 = vand.u32 4294901760, %v1947_v61  ;;  %v4720_v40 = vand.u32 4294901760, %v2052_v6  ;;  %v2221_v8 = vmul.f32 %v2207_v20, %v4739_v55 }
 0x222   :  { %1670 = vmatpush.xpose.msrb.mxu2 %v1643_v56  ;;  %v1644_v59 = vand.u32 4294901760, %v1643_v56  ;;  %v1795_v5 = vsub.f32 %v1751_v51, %v1768_v52  ;;  %v2100_v29 = vand.u32 4294901760, %v4681_v13  ;;  %v1925_v42 = vsub.f32 %v1923_v30, %v1924_v38 }
 0x223   :  { %1623 = vmatmul.f32.vlgmr.msrb.gmra.mxu0 %v1622_v57  ;;  %1697 = vmatmul.f32.vlgmr.msrb.gmra.mxu3 %v1620_v34  ;;  %v1949_v34 = vsub.f32 %v1947_v61, %v1948_v26  ;;  %v4726_v46 = vsub.f32 %v2052_v6, %v4720_v40  ;;  %v2215_v51 = vstv %s4728_s23 }
 0x224   :  { %1719 = vmatpush.xpose.msra.mxu0 %v1644_v59  ;;  %v1796_v60 = vand.u32 4294901760, %v1795_v5  ;;  %v1645_v14 = vsub.f32 %v1643_v56, %v1644_v59  ;;  %v2101_v37 = vsub.f32 %v4681_v13, %v2100_v29  ;;  %v1926_v48 = vand.u32 4294901760, %v1925_v42 }
 0x225   :  { %1673 = vmatmul.f32.vlgmr.msrb.gmra.mxu2 %v1619_v22  ;;  %v2225_v22 = vmul.f32 %v2207_v20, %v4667_v15  ;;  %v1950_v39 = vand.u32 4294901760, %v1949_v34  ;;  %v1136_v54 = vpop.f32.mrf.mxu1 }
 0x226   :  { %1769 = vmatpush.xpose.msra.mxu2 %v1768_v52  ;;  %v1646_v16 = vand.u32 4294901760, %v1645_v14  ;;  %v1797_v17 = vsub.f32 %v1795_v5, %v1796_v60  ;;  %v2102_v41 = vand.u32 4294901760, %v2101_v37 }
 0x227   :  { %v4691_v27 = vadd.f32 %v2225_v22, %v4688_v24 }
 0x228   :  { %1822 = vmatpush.xpose.msrb.mxu0 %v1795_v5  ;;  %1647 = vmatpush.xpose.msrb.mxu1 %v1646_v16  ;;  %v1798_v21 = vand.u32 4294901760, %v1797_v17 }
 0x22a   :  { %1871 = vmatpush.xpose.msrb.mxu2 %v1796_v60  ;;  %1799 = vmatpush.xpose.msra.mxu3 %v1798_v21  ;;  %v1114_v49 = vpop.f32.mrf.mxu0  ;;  %v2229_v60 = vadd.f32 %v2221_v8, %v4688_v24 }
 0x22b   :  { %1649 = vmatmul.f32.vlgmr.msrb.gmra.mxu1 %v4609_v58  ;;  %1721 = vmatmul.f32.vlgmr.msra.gmra.mxu0 %v4609_v58  ;;  %v1016_v33 = vpop.f32.mrf.mxu2 }
 0x22c   :  { %1741 = vmatpush.xpose.msra.mxu1 %v1616_v44  ;;  %1921 = vmatpush.xpose.msra.mxu0 %v4657_v7 }
 0x22d   :  { %1775 = vmatmul.f32.vlgmr.msra.gmra.mxu2 %v1774_v28  ;;  %1801 = vmatmul.f32.vlgmr.msra.gmra.mxu3 %v4641_v36  ;;  %v1242_v2 = vpop.f32.mrf.mxu1 }
 0x22e   :  { %1893 = vmatpush.xpose.msrb.mxu3 %v1768_v52  ;;  %1974 = vmatpush.xpose.msra.mxu2 %v1947_v61 }
 0x230   :  { %1845 = vmatpush.xpose.msrb.mxu1 %v1768_v52  ;;  %v25_v52 = vld [vmem:[%s5210_s3 + $0x20] sm:$0xff] }
 0x232   :  { %1997 = vmatpush.xpose.msra.mxu3 %v4657_v7  ;;  %v1218_v17 = vpop.f32.mrf.mxu0 }
 0x233   :  { %1743 = vmatmul.f32.vlgmr.msra.gmra.mxu1 %v4609_v58  ;;  %1825 = vmatmul.f32.vlgmr.msrb.gmra.mxu0 %v4654_v10  ;;  %v1066_v44 = vpop.f32.mrf.mxu2  ;;  %v2227_v10 = vmul.f32 %v2215_v51, %v4667_v15 }
 0x234   :  { %1951 = vmatpush.xpose.msra.mxu1 %v1950_v39  ;;  %2023 = vmatpush.xpose.msrb.mxu0 %v1948_v26  ;;  %v1042_v43 = vpop.f32.mrf.mxu3  ;;  %v26_v26 = vld [vmem:[%s5210_s3 + $0x30] sm:$0xff] }
 0x235   :  { %1873 = vmatmul.f32.vlgmr.msrb.gmra.mxu2 %v4641_v36  ;;  %1895 = vmatmul.f32.vlgmr.msrb.gmra.mxu3 %v4641_v36  ;;  %v1043_v58 = vadd.f32 %v1042_v43, %v1016_v33  ;;  %v2076_v36 = vand.u32 4294901760, %v4726_v46  ;;  %v4747_v59 = vadd.f32 %v2227_v10, %v25_v52  ;;  %v1346_v6 = vpop.f32.mrf.mxu1 }
 0x236   :  { %2073 = vmatpush.xpose.msrb.mxu2 %v4662_v47  ;;  %2103 = vmatpush.xpose.msrb.mxu3 %v2102_v41 }
 0x237   :  { %v1067_v56 = vadd.f32 %v1066_v44, %v1043_v58 }
 0x23a   :  { %v1320_v32 = vpop.f32.mrf.mxu0 }
 0x23b   :  { %1849 = vmatmul.f32.vlgmr.msrb.gmra.mxu1 %v1772_v11  ;;  %1927 = vmatmul.f32.vlgmr.msra.gmra.mxu0 %v1926_v48  ;;  %v2077_v11 = vsub.f32 %v4726_v46, %v2076_v36  ;;  %s4759_s1 = spop %4165  ;;  %v1347_v39 = vadd.f32 %v1346_v6, %v1320_v32 }
 0x23c   :  { %2045 = vmatpush.xpose.msrb.mxu1 %v4657_v7  ;;  %2126 = vmatpush.xpose.msra.mxu0 %v4681_v13  ;;  %v1090_v57 = vpop.f32.mrf.mxu3  ;;  %v1168_v7 = vpop.f32.mrf.mxu2  ;;  %v2219_v22 = vstv %s4759_s1 }
 0x23d   :  { %1977 = vmatmul.f32.vlgmr.msra.gmra.mxu2 %v1923_v30  ;;  %2001 = vmatmul.f32.vlgmr.msra.gmra.mxu3 %v1924_v38  ;;  %v1091_v5 = vadd.f32 %v1090_v57, %v1067_v56  ;;  %v2078_v14 = vand.u32 4294901760, %v2077_v11  ;;  %v2228_v24 = vmul.f32 %v2219_v22, %v4667_v15  ;;  %v2222_v30 = vmul.f32 %v2211_v18, %v4739_v55 }
 0x23e   :  { %2175 = vmatpush.xpose.msra.mxu2 %v2100_v29  ;;  %2197 = vmatpush.xpose.msra.mxu3 %v4662_v47 }
 0x23f   :  { %v1115_v45 = vadd.f32 %v1114_v49, %v1091_v5  ;;  %v4770_v28 = vadd.f32 %v2228_v24, %v26_v26  ;;  %v2230_v34 = vadd.f32 %v2222_v30, %v4711_v4 }
 0x241   :  { %v1137_v16 = vadd.f32 %v1136_v54, %v1115_v45 }
 0x242   :  { %v1418_v44 = vpop.f32.mrf.mxu0 }
 0x243   :  { %1953 = vmatmul.f32.vlgmr.msra.gmra.mxu1 %v4683_v50  ;;  %2025 = vmatmul.f32.vlgmr.msrb.gmra.mxu0 %v4683_v50  ;;  %v2237_v61 = vmul.f32 0.35355338, %v1137_v16 }
 0x244   :  { %2149 = vmatpush.xpose.msra.mxu1 %v4662_v47  ;;  %v1194_v19 = vpop.f32.mrf.mxu3  ;;  %v1266_v13 = vpop.f32.mrf.mxu2 }
 0x245   :  { %2079 = vmatmul.f32.vlgmr.msrb.gmra.mxu2 %v2078_v14  ;;  %2105 = vmatmul.f32.vlgmr.msrb.gmra.mxu3 %v4720_v40  ;;  %v1195_v20 = vadd.f32 %v1194_v19, %v1168_v7  ;;  %v4761_v21 = vadd.f32 %v2237_v61, %v2229_v60 }
 0x247   :  { %v1219_v25 = vadd.f32 %v1218_v17, %v1195_v20  ;;  %v2253_v47 = vsel %vm986_vm2, %v4761_v21, -inf }
 0x248   :  { %2254 = vmax.xlane.f32.xlu2 %v2253_v47 }
 0x249   :  { %v1243_v29 = vadd.f32 %v1242_v2, %v1219_v25 }
 0x24a   :  { %v1522_v57 = vpop.f32.mrf.mxu0 }
 0x24b   :  { %2047 = vmatmul.f32.vlgmr.msrb.gmra.mxu1 %v4683_v50  ;;  %2129 = vmatmul.f32.vlgmr.msra.gmra.mxu0 %v4726_v46  ;;  %v1267_v15 = vadd.f32 %v1266_v13, %v1243_v29  ;;  %v1440_v46 = vpop.f32.mrf.mxu1 }
 0x24c   :  { %v1288_v33 = vpop.f32.mrf.mxu3  ;;  %v1370_v38 = vpop.f32.mrf.mxu2 }
 0x24d   :  { %2177 = vmatmul.f32.vlgmr.msra.gmra.mxu2 %v4720_v40  ;;  %2199 = vmatmul.f32.vlgmr.msra.gmra.mxu3 %v4720_v40  ;;  %v1289_v12 = vadd.f32 %v1288_v33, %v1267_v15  ;;  %v1371_v50 = vadd.f32 %v1370_v38, %v1347_v39  ;;  %v2223_v40 = vmul.f32 %v2215_v51, %v4739_v55 }
 0x24f   :  { %v2238_v37 = vmul.f32 0.35355338, %v1289_v12  ;;  %v2231_v48 = vadd.f32 %v2223_v40, %v25_v52 }
 0x251   :  { %v4780_v18 = vadd.f32 %v2238_v37, %v2230_v34 }
 0x253   :  { %2153 = vmatmul.f32.vlgmr.msra.gmra.mxu1 %v2076_v36  ;;  %v2256_v41 = vsel %vm986_vm2, %v4780_v18, -inf  ;;  %v1546_v52 = vpop.f32.mrf.mxu1 }
 0x254   :  { %v1394_v42 = vpop.f32.mrf.mxu3  ;;  %2257 = vmax.xlane.f32.xlu0 %v2256_v41  ;;  %v1472_v51 = vpop.f32.mrf.mxu2 }
 0x255   :  { %v1395_v43 = vadd.f32 %v1394_v42, %v1371_v50  ;;  %v4809_v50 = vpop.permute.xlu2 %742 }
 0x257   :  { %v1419_v4 = vadd.f32 %v1418_v44, %v1395_v43 }
 0x259   :  { %v1441_v58 = vadd.f32 %v1440_v46, %v1419_v4 }
 0x25b   :  { %v2239_v49 = vmul.f32 0.35355338, %v1441_v58 }
 0x25c   :  { %v1498_v10 = vpop.f32.mrf.mxu3  ;;  %v1570_v8 = vpop.f32.mrf.mxu2 }
 0x25d   :  { %v4787_v54 = vadd.f32 %v2239_v49, %v2231_v48  ;;  %v1499_v56 = vadd.f32 %v1498_v10, %v1472_v51 }
 0x25f   :  { %v2259_v36 = vsel %vm986_vm2, %v4787_v54, -inf  ;;  %v1523_v5 = vadd.f32 %v1522_v57, %v1499_v56 }
 0x260   :  { %2260 = vmax.xlane.f32.xlu1 %v2259_v36  ;;  %754 = vrot.lane.b32.xlu2 %v4345_v63, %s4248_s6  ;;  %v2224_v63 = vmul.f32 %v2219_v22, %v4739_v55 }
 0x261   :  { %v1547_v7 = vadd.f32 %v1546_v52, %v1523_v5 }
 0x263   :  { %v1571_v11 = vadd.f32 %v1570_v8, %v1547_v7 }
 0x264   :  { %v1592_v45 = vpop.f32.mrf.mxu3 }
 0x265   :  { %v1593_v60 = vadd.f32 %v1592_v45, %v1571_v11 }
 0x267   :  { %v2240_v14 = vmul.f32 0.35355338, %v1593_v60 }
 0x268   :  { %750 = vrot.lane.b32.xlu0 %v4353_v1, %s4248_s6  ;;  %v2232_v1 = vadd.f32 %v2224_v63, %v26_v26 }
 0x26a   :  { %v4800_v16 = vadd.f32 %v2240_v14, %v2232_v1 }
 0x26c   :  { %v2262_v17 = vsel %vm986_vm2, %v4800_v16, -inf }
 0x270   :  { %744 = vrot.lane.b32.xlu0 %v4340_v62, %s4248_s6 }
 0x279   :  { %746 = vrot.lane.b32.xlu1 %v4347_v0, %s4248_s6 }
 0x289   :  { %2263 = vmax.xlane.f32.xlu2 %v2262_v17 }
 0x2a0   :  { %v1624_v62 = vpop.f32.mrf.mxu0 }
 0x2a6   :  { %v1698_v19 = vpop.f32.mrf.mxu3 }
 0x2a8   :  { %v1650_v61 = vpop.f32.mrf.mxu1  ;;  %v1674_v2 = vpop.f32.mrf.mxu2 }
 0x2a9   :  { %v1651_v20 = vadd.f32 %v1650_v61, %v1624_v62  ;;  %v1722_v13 = vpop.f32.mrf.mxu0 }
 0x2ab   :  { %v1675_v24 = vadd.f32 %v1674_v2, %v1651_v20 }
 0x2ad   :  { %v1699_v25 = vadd.f32 %v1698_v19, %v1675_v24 }
 0x2af   :  { %v1723_v0 = vadd.f32 %v1722_v13, %v1699_v25 }
 0x2b0   :  { %v1744_v47 = vpop.f32.mrf.mxu1  ;;  %v1776_v55 = vpop.f32.mrf.mxu2 }
 0x2b1   :  { %v1745_v22 = vadd.f32 %v1744_v47, %v1723_v0  ;;  %v1802_v26 = vpop.f32.mrf.mxu3  ;;  %v1826_v29 = vpop.f32.mrf.mxu0 }
 0x2b2   :  { %v1803_v15 = vadd.f32 %v1802_v26, %v1776_v55 }
 0x2b3   :  { %v2241_v30 = vmul.f32 0.35355338, %v1745_v22 }
 0x2b4   :  { %v1827_v33 = vadd.f32 %v1826_v29, %v1803_v15 }
 0x2b5   :  { %v4805_v32 = vadd.f32 %v2241_v30, %v4691_v27 }
 0x2b7   :  { %v2265_v34 = vsel %vm986_vm2, %v4805_v32, -inf }
 0x2b8   :  { %v1850_v12 = vpop.f32.mrf.mxu1  ;;  %v1874_v6 = vpop.f32.mrf.mxu2  ;;  %2266 = vmax.xlane.f32.xlu0 %v2265_v34 }
 0x2b9   :  { %v1851_v37 = vadd.f32 %v1850_v12, %v1827_v33  ;;  %v1896_v38 = vpop.f32.mrf.mxu3  ;;  %v1928_v39 = vpop.f32.mrf.mxu0 }
 0x2bb   :  { %v1875_v41 = vadd.f32 %v1874_v6, %v1851_v37  ;;  %v2255_v58 = vpop.xlane.xlu2 %2254 }
 0x2bc   :  { %v2277_v51 = vsub.f32 %v4761_v21, %v2255_v58 }
 0x2bd   :  { %v1897_v42 = vadd.f32 %v1896_v38, %v1875_v41 }
 0x2be   :  { %v2285_v8 = vmul.f32 1.442695, %v2277_v51 }
 0x2bf   :  { %v2242_v43 = vmul.f32 0.35355338, %v1897_v42 }
 0x2c0   :  { %v1954_v40 = vpop.f32.mrf.mxu1  ;;  %v1978_v44 = vpop.f32.mrf.mxu2  ;;  %4181 = vpow2.f32 %v2285_v8 }
 0x2c1   :  { %v1955_v4 = vadd.f32 %v1954_v40, %v1928_v39  ;;  %v2002_v27 = vpop.f32.mrf.mxu3  ;;  %v4812_v46 = vadd.f32 %v2242_v43, %v4715_v35  ;;  %v2026_v36 = vpop.f32.mrf.mxu0 }
 0x2c3   :  { %v1979_v48 = vadd.f32 %v1978_v44, %v1955_v4  ;;  %v2268_v49 = vsel %vm986_vm2, %v4812_v46, -inf  ;;  %v755_v12 = vpop.permute.xlu2 %754 }
 0x2c4   :  { %2269 = vmax.xlane.f32.xlu0 %v2268_v49  ;;  %v778_v38 = vrot.slane %v755_v12, 4 }
 0x2c5   :  { %v2003_v10 = vadd.f32 %v2002_v27, %v1979_v48 }
 0x2c6   :  { %v4823_v19 = vpop.eup %4181 }
 0x2c7   :  { %v2027_v56 = vadd.f32 %v2026_v36, %v2003_v10  ;;  %v2258_v63 = vpop.xlane.xlu0 %2257  ;;  %v2301_v47 = vsel %vm986_vm2, %v4823_v19, 0.0 }
 0x2c8   :  { %v2048_v57 = vpop.f32.mrf.mxu1  ;;  %v2080_v5 = vpop.f32.mrf.mxu2  ;;  %v2278_v21 = vsub.f32 %v4780_v18, %v2258_v63 }
 0x2c9   :  { %v2049_v52 = vadd.f32 %v2048_v57, %v2027_v56  ;;  %v2106_v7 = vpop.f32.mrf.mxu3  ;;  %v2130_v60 = vpop.f32.mrf.mxu0 }
 0x2ca   :  { %v2107_v45 = vadd.f32 %v2106_v7, %v2080_v5  ;;  %v2287_v13 = vmul.f32 1.442695, %v2278_v21 }
 0x2cb   :  { %v2243_v11 = vmul.f32 0.35355338, %v2049_v52 }
 0x2cc   :  { %v2131_v1 = vadd.f32 %v2130_v60, %v2107_v45  ;;  %4183 = vpow2.f32 %v2287_v13 }
 0x2cd   :  { %v4818_v35 = vadd.f32 %v2243_v11, %v4747_v59 }
 0x2cf   :  { %v2271_v14 = vsel %vm986_vm2, %v4818_v35, -inf }
 0x2d0   :  { %v2154_v17 = vpop.f32.mrf.mxu1  ;;  %2272 = vmax.xlane.f32.xlu1 %v2271_v14  ;;  %v2178_v61 = vpop.f32.mrf.mxu2 }
 0x2d1   :  { %v2155_v62 = vadd.f32 %v2154_v17, %v2131_v1  ;;  %v2200_v20 = vpop.f32.mrf.mxu3 }
 0x2d2   :  { %v4833_v26 = vpop.eup %4183 }
 0x2d3   :  { %v2179_v2 = vadd.f32 %v2178_v61, %v2155_v62  ;;  %v2261_v24 = vpop.xlane.xlu1 %2260  ;;  %v2304_v15 = vsel %vm986_vm2, %v4833_v26, 0.0 }
 0x2d4   :  { %v2279_v25 = vsub.f32 %v4787_v54, %v2261_v24 }
 0x2d5   :  { %v2201_v59 = vadd.f32 %v2200_v20, %v2179_v2 }
 0x2d6   :  { %v2289_v55 = vmul.f32 1.442695, %v2279_v25 }
 0x2d7   :  { %v2244_v0 = vmul.f32 0.35355338, %v2201_v59 }
 0x2d8   :  { %2302 = vadd.xlane.f32.xlu1 %v2301_v47  ;;  %4185 = vpow2.f32 %v2289_v55 }
 0x2d9   :  { %v4829_v18 = vadd.f32 %v2244_v0, %v4770_v28  ;;  %v768_v28 = vrot.slane %v4809_v50, 4 }
 0x2da   :  { %v751_v54 = vpop.permute.xlu0 %750 }
 0x2db   :  { %v2274_v22 = vsel %vm986_vm2, %v4829_v18, -inf  ;;  %v766_v33 = vrot.slane %v751_v54, 4  ;;  %v769_v6 = vsel %vm278_vm1, %v751_v54, %v768_v28 }
 0x2dc   :  { %2275 = vmax.xlane.f32.xlu2 %v2274_v22  ;;  %v777_v39 = vperm.slane %v769_v6, %v4369_v9 }
 0x2dd   :  { %v767_v34 = vsel %vm278_vm1, %v766_v33, %v4809_v50 }
 0x2de   :  { %v4835_v29 = vpop.eup %4185  ;;  %v773_v37 = vperm.slane %v767_v34, %v4369_v9  ;;  %v804_v27 = vrot.slane %v777_v39, 4 }
 0x2df   :  { %v2307_v30 = vsel %vm986_vm2, %v4835_v29, 0.0 }
 0x2e0   :  { %2308 = vadd.xlane.f32.xlu0 %v2307_v30  ;;  %v792_v40 = vrot.slane %v773_v37, 4 }
 0x2e4   :  { %2305 = vadd.xlane.f32.xlu2 %v2304_v15 }
 0x2eb   :  { %v747_v41 = vpop.permute.xlu1 %746 }
 0x2ec   :  { %v779_v42 = vsel %vm278_vm1, %v778_v38, %v747_v41  ;;  %v780_v43 = vrot.slane %v747_v41, 4 }
 0x2ed   :  { %v785_v44 = vperm.slane %v779_v42, %v4369_v9 }
 0x2ee   :  { %v781_v4 = vsel %vm278_vm1, %v755_v12, %v780_v43 }
 0x2ef   :  { %v789_v50 = vperm.slane %v781_v4, %v4369_v9  ;;  %v790_v58 = vrot.slane %v785_v44, 4  ;;  %v793_v48 = vsel %vm278_vm1, %v785_v44, %v792_v40 }
 0x2f0   :  { %v801_v49 = vperm.slane %v793_v48, %v4382_v23 }
 0x2f1   :  { %v791_v36 = vsel %vm278_vm1, %v790_v58, %v773_v37  ;;  %v802_v10 = vrot.slane %v789_v50, 4  ;;  %v805_v51 = vsel %vm278_vm1, %v789_v50, %v804_v27 }
 0x2f2   :  { %v797_v56 = vperm.slane %v791_v36, %v4382_v23  ;;  %v813_v57 = vperm.slane %v805_v51, %v4382_v23  ;;  %v816_v5 = vrot.slane %v801_v49, 4 }
 0x2f3   :  { %v803_v52 = vsel %vm278_vm1, %v802_v10, %v777_v39 }
 0x2f4   :  { %v809_v7 = vperm.slane %v803_v52, %v4382_v23  ;;  %v814_v8 = vrot.slane %v797_v56, 4  ;;  %v817_v11 = vsel %vm278_vm1, 0.0, %v816_v5  ;;  %v820_v45 = vrot.slane %v813_v57, 4  ;;  %756 = vrot.lane.b32.xlu0 %v4448_v31, %s4248_s6  ;;  %v4906_v52 = vpop.permute.xlu0 %744 }
 0x2f5   :  { %v878_v63 = vsel %vm278_vm1, %v816_v5, %v797_v56  ;;  %v883_v60 = vrot.slane %v817_v11, 4 }
 0x2f6   :  { %v815_v1 = vsel %vm278_vm1, 0.0, %v814_v8  ;;  %v818_v14 = vrot.slane %v809_v7, 4  ;;  %v821_v17 = vsel %vm278_vm1, 0.0, %v820_v45  ;;  %v882_v21 = vperm.slane %v878_v63, %v4369_v9 }
 0x2f7   :  { %v884_v62 = vsel %vm278_vm1, %v883_v60, %v815_v1  ;;  %v889_v61 = vsel %vm278_vm1, %v820_v45, %v809_v7  ;;  %v894_v2 = vrot.slane %v821_v17, 4 }
 0x2f8   :  { %v819_v20 = vsel %vm278_vm1, 0.0, %v818_v14  ;;  %v888_v13 = vperm.slane %v884_v62, %v4369_v9  ;;  %v893_v31 = vperm.slane %v889_v61, %v4369_v9  ;;  %v902_v59 = vrot.slane %v882_v21, 4 }
 0x2f9   :  { %v895_v24 = vsel %vm278_vm1, %v894_v2, %v819_v20 }
 0x2fa   :  { %v899_v25 = vperm.slane %v895_v24, %v4369_v9  ;;  %v914_v0 = vrot.slane %v893_v31, 4  ;;  %v900_v47 = vrot.slane %v888_v13, 4  ;;  %v903_v55 = vsel %vm278_vm1, %v888_v13, %v902_v59 }
 0x2fb   :  { %v911_v22 = vperm.slane %v903_v55, %v4382_v23 }
 0x2fc   :  { %748 = vrot.lane.b32.xlu2 %v4361_v3, %s4248_s6  ;;  %v2264_v54 = vpop.xlane.xlu2 %2263  ;;  %v901_v30 = vsel %vm278_vm1, %v900_v47, %v882_v21  ;;  %v912_v15 = vrot.slane %v899_v25, 4  ;;  %v915_v33 = vsel %vm278_vm1, %v899_v25, %v914_v0 }
 0x2fd   :  { %v2280_v28 = vsub.f32 %v4800_v16, %v2264_v54  ;;  %v907_v34 = vperm.slane %v901_v30, %v4382_v23  ;;  %v923_v12 = vperm.slane %v915_v33, %v4382_v23  ;;  %v930_v6 = vrot.slane %v911_v22, 4 }
 0x2fe   :  { %v913_v3 = vsel %vm278_vm1, %v912_v15, %v893_v31 }
 0x2ff   :  { %v2291_v37 = vmul.f32 1.442695, %v2280_v28  ;;  %v919_v38 = vperm.slane %v913_v3, %v4382_v23  ;;  %v926_v39 = vrot.slane %v907_v34, 4  ;;  %v928_v41 = vrot.slane %v923_v12, 4 }
 0x300   :  { %v4885_v42 = vsel %vm278_vm1, %v923_v12, %v930_v6 }
 0x301   :  { %4187 = vpow2.f32 %v2291_v37  ;;  %v924_v43 = vrot.slane %v919_v38, 4  ;;  %v927_v40 = vsel %vm278_vm1, %v919_v38, %v926_v39  ;;  %v4889_v16 = vsel %vm278_vm1, %v928_v41, %v911_v22 }
 0x302   :  { %v4891_v44 = vand.u32 4294901760, %v927_v40  ;;  %v4927_v54 = vand.u32 4294901760, %v4889_v16 }
 0x303   :  { %v925_v4 = vsel %vm278_vm1, %v924_v43, %v907_v34 }
 0x304   :  { %v2463_v27 = vand.u32 4294901760, %v925_v4  ;;  %v4895_v50 = vsub.f32 %v927_v40, %v4891_v44  ;;  %v4935_v6 = vsub.f32 %v4889_v16, %v4927_v54 }
 0x306   :  { %2464 = vmatpush.msrb.mxu0 %v2463_v27  ;;  %2540 = vmatpush.msrb.mxu3 %v2463_v27  ;;  %v2490_v58 = vsub.f32 %v925_v4, %v2463_v27  ;;  %v2640_v48 = vand.u32 4294901760, %v4895_v50 }
 0x307   :  { %v4898_v49 = vpop.eup %4187 }
 0x308   :  { %2517 = vmatpush.msrb.mxu2 %v2490_v58  ;;  %v2310_v36 = vsel %vm986_vm2, %v4898_v49, 0.0  ;;  %v2491_v10 = vand.u32 4294901760, %v2490_v58  ;;  %v2641_v51 = vsub.f32 %v4895_v50, %v2640_v48 }
 0x309   :  { %2311 = vadd.xlane.f32.xlu1 %v2310_v36 }
 0x30a   :  { %2613 = vmatpush.msra.mxu2 %v4891_v44  ;;  %2566 = vmatpush.msra.mxu0 %v2491_v10  ;;  %v2642_v56 = vand.u32 4294901760, %v2641_v51  ;;  %v2492_v57 = vsub.f32 %v2490_v58, %v2491_v10 }
 0x30c   :  { %2643 = vmatpush.msra.mxu3 %v2642_v56  ;;  %v2493_v5 = vand.u32 4294901760, %v2492_v57 }
 0x30e   :  { %2494 = vmatpush.msrb.mxu1 %v2493_v5 }
 0x310   :  { %2588 = vmatpush.msra.mxu1 %v2463_v27  ;;  %v2789_v27 = vand.u32 4294901760, %v4935_v6 }
 0x322   :  { %752 = vrot.lane.b32.xlu1 %v4409_v53, %s4248_s6 }
 0x32b   :  { %v2267_v7 = vpop.xlane.xlu0 %2266 }
 0x32c   :  { %v2281_v8 = vsub.f32 %v4805_v32, %v2267_v7 }
 0x32e   :  { %v2293_v11 = vmul.f32 1.442695, %v2281_v8  ;;  %v2790_v8 = vsub.f32 %v4935_v6, %v2789_v27 }
 0x330   :  { %4189 = vpow2.f32 %v2293_v11  ;;  %v2910_v11 = vand.u32 4294901760, %v4885_v42 }
 0x336   :  { %v4911_v45 = vpop.eup %4189 }
 0x337   :  { %v2270_v63 = vpop.xlane.xlu0 %2269  ;;  %v2313_v60 = vsel %vm986_vm2, %v4911_v45, 0.0 }
 0x338   :  { %v2282_v1 = vsub.f32 %v4812_v46, %v2270_v63  ;;  %2314 = vadd.xlane.f32.xlu2 %v2313_v60 }
 0x33a   :  { %v2295_v14 = vmul.f32 1.442695, %v2282_v1 }
 0x33c   :  { %4191 = vpow2.f32 %v2295_v14 }
 0x342   :  { %v4916_v17 = vpop.eup %4191 }
 0x343   :  { %v2273_v21 = vpop.xlane.xlu1 %2272  ;;  %v2316_v53 = vsel %vm986_vm2, %v4916_v17, 0.0 }
 0x344   :  { %v2283_v32 = vsub.f32 %v4818_v35, %v2273_v21  ;;  %2317 = vadd.xlane.f32.xlu0 %v2316_v53 }
 0x346   :  { %v2297_v62 = vmul.f32 1.442695, %v2283_v32 }
 0x348   :  { %4193 = vpow2.f32 %v2297_v62 }
 0x34b   :  { %v2303_v61 = vpop.xlane.xlu1 %2302 }
 0x34c   :  { %4195 = vrcp.f32 %v2303_v61  ;;  %v2336_v0 = vand.u32 2147483648, %v2303_v61  ;;  %v2334_v55 = vand.u32 2147483647, %v2303_v61  ;;  %vm2330_vm4 = vweird.f32 %v2303_v61 }
 0x34e   :  { %v4921_v2 = vpop.eup %4193  ;;  %v2337_v15 = vor.u32 1.1754944e-38, %v2336_v0  ;;  %vm2335_vm6 = vcmp.eq.f32.partialorder %v2334_v55, 8.507059e+37 }
 0x34f   :  { %v2276_v20 = vpop.xlane.xlu2 %2275  ;;  %v2319_v46 = vsel %vm986_vm2, %v4921_v2, 0.0 }
 0x350   :  { %v2284_v13 = vsub.f32 %v4829_v18, %v2276_v20  ;;  %2320 = vadd.xlane.f32.xlu1 %v2319_v46  ;;  %v2937_v46 = vsub.f32 %v4885_v42, %v2910_v11 }
 0x352   :  { %v4196_v31 = vpop.eup %4195  ;;  %v2299_v59 = vmul.f32 1.442695, %v2284_v13 }
 0x353   :  { %v2326_v24 = vmul.f32 %v4196_v31, %v2303_v61  ;;  %v2309_v35 = vpop.xlane.xlu0 %2308  ;;  %vm2331_vm3 = vweird.f32 %v4196_v31  ;;  %v2791_v61 = vand.u32 4294901760, %v2790_v8 }
 0x354   :  { %4197 = vpow2.f32 %v2299_v59  ;;  %vm2332_vm5 = vmor %vm2330_vm4, %vm2331_vm3  ;;  %v2366_v40 = vand.u32 2147483648, %v2309_v35  ;;  %v2364_v36 = vand.u32 2147483647, %v2309_v35  ;;  %vm2360_vm8 = vweird.f32 %v2309_v35 }
 0x355   :  { %v2327_v25 = vsub.f32 1.0, %v2326_v24  ;;  %4199 = vrcp.f32 %v2309_v35  ;;  %v2938_v59 = vand.u32 4294901760, %v2937_v46 }
 0x356   :  { %v2367_v5 = vor.u32 1.1754944e-38, %v2366_v40  ;;  %vm2365_vm11 = vcmp.eq.f32.partialorder %v2364_v36, 8.507059e+37 }
 0x357   :  { %v2328_v47 = vmul.f32 %v4196_v31, %v2327_v25  ;;  %v2306_v22 = vpop.xlane.xlu2 %2305  ;;  %v2939_v42 = vsub.f32 %v2937_v46, %v2938_v59 }
 0x358   :  { %4201 = vrcp.f32 %v2306_v22  ;;  %v2351_v51 = vand.u32 2147483648, %v2306_v22  ;;  %vm2345_vm12 = vweird.f32 %v2306_v22 }
 0x359   :  { %v2329_v30 = vadd.f32 %v4196_v31, %v2328_v47  ;;  %v2940_v0 = vand.u32 4294901760, %v2939_v42 }
 0x35a   :  { %v4929_v18 = vpop.eup %4197  ;;  %v2352_v14 = vor.u32 1.1754944e-38, %v2351_v51 }
 0x35b   :  { %v2333_v33 = vsel %vm2332_vm5, %v4196_v31, %v2329_v30  ;;  %v2322_v28 = vsel %vm986_vm2, %v4929_v18, 0.0  ;;  %v4200_v34 = vpop.eup %4199 }
 0x35c   :  { %v2338_v12 = vsel %vm2335_vm6, %v2337_v15, %v2333_v33  ;;  %2323 = vadd.xlane.f32.xlu2 %v2322_v28  ;;  %v2356_v3 = vmul.f32 %v4200_v34, %v2309_v35  ;;  %vm2361_vm7 = vweird.f32 %v4200_v34 }
 0x35d   :  { %v2339_v37 = vmul.f32 %v4823_v19, %v2338_v12  ;;  %v2349_v19 = vand.u32 2147483647, %v2306_v22  ;;  %vm2362_vm10 = vmor %vm2360_vm8, %vm2361_vm7 }
 0x35e   :  { %v4202_v38 = vpop.eup %4201  ;;  %v2357_v39 = vsub.f32 1.0, %v2356_v3 }
 0x35f   :  { %v2341_v41 = vmul.f32 %v4202_v38, %v2306_v22  ;;  %v2446_v43 = vsel %vm986_vm2, %v2339_v37, 0  ;;  %vm2346_vm9 = vweird.f32 %v4202_v38  ;;  %vm2350_vm14 = vcmp.eq.f32.partialorder %v2349_v19, 8.507059e+37 }
 0x360   :  { %v2465_v4 = vand.u32 4294901760, %v2446_v43  ;;  %v2358_v58 = vmul.f32 %v4200_v34, %v2357_v39  ;;  %vm2347_vm13 = vmor %vm2345_vm12, %vm2346_vm9 }
 0x361   :  { %v2342_v10 = vsub.f32 1.0, %v2341_v41 }
 0x362   :  { %2496 = vmatmul.f32.vlgmr.msrb.gmra.mxu1 %v2465_v4  ;;  %v2466_v16 = vsub.f32 %v2446_v43, %v2465_v4  ;;  %v2359_v56 = vadd.f32 %v4200_v34, %v2358_v58 }
 0x363   :  { %v2343_v57 = vmul.f32 %v4202_v38, %v2342_v10  ;;  %2689 = vmatpush.msrb.mxu1 %v4891_v44 }
 0x364   :  { %2520 = vmatmul.f32.vlgmr.msrb.gmra.mxu2 %v2466_v16  ;;  %v2467_v7 = vand.u32 4294901760, %v2466_v16  ;;  %v2363_v63 = vsel %vm2362_vm10, %v4200_v34, %v2359_v56 }
 0x365   :  { %v2344_v60 = vadd.f32 %v4202_v38, %v2343_v57  ;;  %2715 = vmatpush.msrb.mxu2 %v2640_v48  ;;  %v2368_v1 = vsel %vm2365_vm11, %v2367_v5, %v2363_v63 }
 0x366   :  { %2544 = vmatmul.f32.vlgmr.msrb.gmra.mxu3 %v2467_v7  ;;  %v2468_v21 = vsub.f32 %v2466_v16, %v2467_v7  ;;  %v2369_v13 = vmul.f32 %v4835_v29, %v2368_v1  ;;  %v757_v3 = vpop.permute.xlu0 %756  ;;  %v824_v16 = vrot.slane %v4906_v52, 4 }
 0x367   :  { %v2348_v53 = vsel %vm2347_vm13, %v4202_v38, %v2344_v60  ;;  %2737 = vmatpush.msrb.mxu3 %v4891_v44  ;;  %v834_v43 = vrot.slane %v757_v3, 4 }
 0x368   :  { %v2353_v32 = vsel %vm2350_vm14, %v2352_v14, %v2348_v53  ;;  %v2469_v62 = vand.u32 4294901760, %v2468_v21  ;;  %v2744_v44 = vsel %vm986_vm2, %v2369_v13, 0 }
 0x369   :  { %v2354_v20 = vmul.f32 %v4833_v26, %v2353_v32  ;;  %v2763_v25 = vand.u32 4294901760, %v2744_v44 }
 0x36a   :  { %2470 = vmatmul.f32.vlgmr.msrb.gmra.mxu0 %v2469_v62  ;;  %2590 = vmatmul.f32.vlgmr.msra.gmra.mxu1 %v2465_v4 }
 0x36b   :  { %2666 = vmatpush.msrb.mxu0 %v4895_v50  ;;  %2792 = vmatpush.msra.mxu1 %v2791_v61  ;;  %v2595_v48 = vsel %vm986_vm2, %v2354_v20, 0  ;;  %v2764_v35 = vsub.f32 %v2744_v44, %v2763_v25 }
 0x36c   :  { %v2614_v31 = vand.u32 4294901760, %v2595_v48 }
 0x36d   :  { %v2765_v47 = vand.u32 4294901760, %v2764_v35 }
 0x36e   :  { %v2615_v24 = vsub.f32 %v2595_v48, %v2614_v31  ;;  %2645 = vmatmul.f32.vlgmr.msra.gmra.mxu3 %v2614_v31 }
 0x36f   :  { %2838 = vmatpush.msra.mxu3 %v4927_v54  ;;  %v2766_v55 = vsub.f32 %v2764_v35, %v2765_v47 }
 0x370   :  { %v2616_v26 = vand.u32 4294901760, %v2615_v24 }
 0x372   :  { %2568 = vmatmul.f32.vlgmr.msra.gmra.mxu0 %v2465_v4  ;;  %2693 = vmatmul.f32.vlgmr.msrb.gmra.mxu1 %v2616_v26  ;;  %v2617_v29 = vsub.f32 %v2615_v24, %v2616_v26 }
 0x373   :  { %2762 = vmatpush.msra.mxu0 %v4927_v54  ;;  %2886 = vmatpush.msrb.mxu1 %v4927_v54  ;;  %v2767_v54 = vand.u32 4294901760, %v2766_v55 }
 0x374   :  { %v2618_v50 = vand.u32 4294901760, %v2617_v29 }
 0x376   :  { %2619 = vmatmul.f32.vlgmr.msra.gmra.mxu2 %v2618_v50  ;;  %2739 = vmatmul.f32.vlgmr.msrb.gmra.mxu3 %v2614_v31 }
 0x377   :  { %2815 = vmatpush.msra.mxu2 %v4935_v6  ;;  %2941 = vmatpush.msrb.mxu3 %v2940_v0  ;;  %v749_v6 = vpop.permute.xlu2 %748 }
 0x378   :  { %v836_v41 = vrot.slane %v749_v6, 4  ;;  %v835_v36 = vsel %vm278_vm1, %v834_v43, %v749_v6 }
 0x379   :  { %v841_v57 = vperm.slane %v835_v36, %v4369_v9 }
 0x37a   :  { %2669 = vmatmul.f32.vlgmr.msrb.gmra.mxu0 %v2615_v24  ;;  %2794 = vmatmul.f32.vlgmr.msra.gmra.mxu1 %v2763_v25 }
 0x37b   :  { %2864 = vmatpush.msrb.mxu0 %v2789_v27  ;;  %2987 = vmatpush.msra.mxu1 %v2910_v11  ;;  %v837_v27 = vsel %vm278_vm1, %v757_v3, %v836_v41  ;;  %v846_v1 = vrot.slane %v841_v57, 4 }
 0x37c   :  { %v2312_v22 = vpop.xlane.xlu1 %2311  ;;  %v845_v51 = vperm.slane %v837_v27, %v4369_v9 }
 0x37d   :  { %4203 = vrcp.f32 %v2312_v22  ;;  %v2381_v28 = vand.u32 2147483648, %v2312_v22  ;;  %v2379_v12 = vand.u32 2147483647, %v2312_v22  ;;  %vm2375_vm3 = vweird.f32 %v2312_v22 }
 0x37e   :  { %2717 = vmatmul.f32.vlgmr.msrb.gmra.mxu2 %v2614_v31  ;;  %2842 = vmatmul.f32.vlgmr.msra.gmra.mxu3 %v2765_v47  ;;  %v858_v8 = vrot.slane %v845_v51, 4 }
 0x37f   :  { %2911 = vmatpush.msrb.mxu2 %v2910_v11  ;;  %3035 = vmatpush.msra.mxu3 %v2910_v11  ;;  %v2382_v38 = vor.u32 1.1754944e-38, %v2381_v28  ;;  %vm2380_vm5 = vcmp.eq.f32.partialorder %v2379_v12, 8.507059e+37 }
 0x382   :  { %2768 = vmatmul.f32.vlgmr.msra.gmra.mxu0 %v2767_v54  ;;  %2888 = vmatmul.f32.vlgmr.msrb.gmra.mxu1 %v2763_v25 }
 0x383   :  { %2964 = vmatpush.msra.mxu0 %v2937_v46  ;;  %v4204_v30 = vpop.eup %4203 }
 0x384   :  { %v2371_v15 = vmul.f32 %v4204_v30, %v2312_v22  ;;  %vm2376_vm15 = vweird.f32 %v4204_v30 }
 0x385   :  { %vm2377_vm4 = vmor %vm2375_vm3, %vm2376_vm15 }
 0x386   :  { %2818 = vmatmul.f32.vlgmr.msra.gmra.mxu2 %v2764_v35  ;;  %v2372_v33 = vsub.f32 1.0, %v2371_v15 }
 0x387   :  { %3013 = vmatpush.msra.mxu2 %v2938_v59 }
 0x388   :  { %v2373_v34 = vmul.f32 %v4204_v30, %v2372_v33 }
 0x38a   :  { %2866 = vmatmul.f32.vlgmr.msrb.gmra.mxu0 %v2763_v25  ;;  %v2374_v37 = vadd.f32 %v4204_v30, %v2373_v34 }
 0x38c   :  { %v2378_v39 = vsel %vm2377_vm4, %v4204_v30, %v2374_v37 }
 0x38d   :  { %v2383_v40 = vsel %vm2380_vm5, %v2382_v38, %v2378_v39 }
 0x38e   :  { %v2384_v4 = vmul.f32 %v4898_v49, %v2383_v40 }
 0x390   :  { %v2893_v58 = vsel %vm986_vm2, %v2384_v4, 0 }
 0x391   :  { %v2912_v10 = vand.u32 4294901760, %v2893_v58 }
 0x393   :  { %2943 = vmatmul.f32.vlgmr.msrb.gmra.mxu3 %v2912_v10  ;;  %v2913_v56 = vsub.f32 %v2893_v58, %v2912_v10 }
 0x394   :  { %v753_v19 = vpop.permute.xlu1 %752 }
 0x395   :  { %v822_v5 = vrot.slane %v753_v19, 4  ;;  %v825_v7 = vsel %vm278_vm1, %v753_v19, %v824_v16  ;;  %2967 = vmatmul.f32.vlgmr.msra.gmra.mxu0 %v2913_v56  ;;  %v2914_v49 = vand.u32 4294901760, %v2913_v56 }
 0x396   :  { %v833_v11 = vperm.slane %v825_v7, %v4369_v9 }
 0x397   :  { %v823_v63 = vsel %vm278_vm1, %v822_v5, %v4906_v52  ;;  %2991 = vmatmul.f32.vlgmr.msra.gmra.mxu1 %v2914_v49  ;;  %v2915_v60 = vsub.f32 %v2913_v56, %v2914_v49 }
 0x398   :  { %v829_v14 = vperm.slane %v823_v63, %v4369_v9  ;;  %v859_v21 = vsel %vm278_vm1, %v858_v8, %v833_v11  ;;  %v860_v53 = vrot.slane %v833_v11, 4 }
 0x399   :  { %v865_v32 = vperm.slane %v859_v21, %v4382_v23  ;;  %v2916_v62 = vand.u32 4294901760, %v2915_v60 }
 0x39a   :  { %v847_v61 = vsel %vm278_vm1, %v846_v1, %v829_v14  ;;  %v848_v20 = vrot.slane %v829_v14, 4  ;;  %v861_v46 = vsel %vm278_vm1, %v845_v51, %v860_v53 }
 0x39b   :  { %v853_v13 = vperm.slane %v847_v61, %v4382_v23  ;;  %v869_v52 = vperm.slane %v861_v46, %v4382_v23  ;;  %2917 = vmatmul.f32.vlgmr.msrb.gmra.mxu2 %v2916_v62  ;;  %3037 = vmatmul.f32.vlgmr.msra.gmra.mxu3 %v2912_v10  ;;  %v874_v59 = vrot.slane %v865_v32, 4  ;;  %v4213_v61 = vld [vmem:[%s5209_s2 + $0x18] sm:$0xff] }
 0x39c   :  { %v849_v48 = vsel %vm278_vm1, %v841_v57, %v848_v20  ;;  %3899 = vrot.lane.b32.xlu0 %v4213_v61, %s4251_s30 }
 0x39d   :  { %v857_v31 = vperm.slane %v849_v48, %v4382_v23  ;;  %v876_v44 = vrot.slane %v869_v52, 4  ;;  %v870_v24 = vrot.slane %v853_v13, 4  ;;  %v875_v35 = vsel %vm278_vm1, 0.0, %v874_v59 }
 0x39f   :  { %v872_v26 = vrot.slane %v857_v31, 4  ;;  %v877_v25 = vsel %vm278_vm1, 0.0, %v876_v44  ;;  %v943_v42 = vsel %vm278_vm1, %v876_v44, %v865_v32  ;;  %v871_v54 = vsel %vm278_vm1, 0.0, %v870_v24 }
 0x3a0   :  { %v948_v29 = vrot.slane %v877_v25, 4  ;;  %v947_v0 = vperm.slane %v943_v42, %v4369_v9 }
 0x3a1   :  { %v873_v50 = vsel %vm278_vm1, 0.0, %v872_v26  ;;  %v932_v47 = vsel %vm278_vm1, %v872_v26, %v853_v13 }
 0x3a2   :  { %v937_v55 = vrot.slane %v873_v50, 4  ;;  %v949_v22 = vsel %vm278_vm1, %v948_v29, %v875_v35  ;;  %v936_v33 = vperm.slane %v932_v47, %v4369_v9  ;;  %v968_v12 = vrot.slane %v947_v0, 4  ;;  %v4214_v35 = vld [vmem:[%s5209_s2 + $0x10] sm:$0xff] }
 0x3a3   :  { %v953_v30 = vperm.slane %v949_v22, %v4369_v9  ;;  %3015 = vmatmul.f32.vlgmr.msra.gmra.mxu2 %v2912_v10 }
 0x3a4   :  { %v938_v15 = vsel %vm278_vm1, %v937_v55, %v871_v54  ;;  %v956_v38 = vrot.slane %v936_v33, 4  ;;  %3897 = vrot.lane.b32.xlu0 %v4214_v35, %s4251_s30 }
 0x3a5   :  { %v942_v28 = vperm.slane %v938_v15, %v4369_v9  ;;  %v966_v34 = vrot.slane %v953_v30, 4  ;;  %v969_v39 = vsel %vm278_vm1, %v953_v30, %v968_v12 }
 0x3a6   :  { %v4999_v27 = vperm.slane %v969_v39, %v4382_v23  ;;  %v4215_v39 = vld [vmem:[%s5209_s2 + $0x8] sm:$0xff] }
 0x3a7   :  { %v954_v6 = vrot.slane %v942_v28, 4  ;;  %v967_v3 = vsel %vm278_vm1, %v966_v34, %v947_v0  ;;  %v957_v10 = vsel %vm278_vm1, %v942_v28, %v956_v38 }
 0x3a8   :  { %v973_v37 = vperm.slane %v967_v3, %v4382_v23  ;;  %v965_v5 = vperm.slane %v957_v10, %v4382_v23  ;;  %v982_v7 = vrot.slane %v4999_v27, 4 }
 0x3a9   :  { %v955_v43 = vsel %vm278_vm1, %v954_v6, %v936_v33 }
 0x3aa   :  { %v961_v40 = vperm.slane %v955_v43, %v4382_v23  ;;  %v978_v4 = vrot.slane %v973_v37, 4  ;;  %v983_v21 = vsel %vm278_vm1, %v982_v7, %v965_v5  ;;  %v984_v50 = vrot.slane %v965_v5, 4 }
 0x3ab   :  { %v2315_v41 = vpop.xlane.xlu2 %2314  ;;  %v5019_v52 = vand.u32 4294901760, %v983_v21 }
 0x3ac   :  { %4205 = vrcp.f32 %v2315_v41  ;;  %v979_v58 = vsel %vm278_vm1, %v978_v4, %v961_v40  ;;  %v980_v36 = vrot.slane %v961_v40, 4  ;;  %v2396_v60 = vand.u32 2147483648, %v2315_v41  ;;  %3895 = vrot.lane.b32.xlu0 %v4215_v39, %s4251_s30 }
 0x3ad   :  { %v3059_v51 = vand.u32 4294901760, %v979_v58  ;;  %v2394_v32 = vand.u32 2147483647, %v2315_v41  ;;  %vm2390_vm7 = vweird.f32 %v2315_v41  ;;  %v5023_v26 = vsub.f32 %v983_v21, %v5019_v52 }
 0x3ae   :  { %v981_v16 = vsel %vm278_vm1, %v973_v37, %v980_v36  ;;  %v2397_v48 = vor.u32 1.1754944e-38, %v2396_v60  ;;  %v985_v33 = vsel %vm278_vm1, %v4999_v27, %v984_v50 }
 0x3af   :  { %3060 = vmatpush.msrb.mxu0 %v3059_v51  ;;  %3136 = vmatpush.msrb.mxu3 %v3059_v51  ;;  %v3086_v57 = vsub.f32 %v979_v58, %v3059_v51  ;;  %v5004_v19 = vand.u32 4294901760, %v981_v16  ;;  %vm2395_vm9 = vcmp.eq.f32.partialorder %v2394_v32, 8.507059e+37  ;;  %v3385_v55 = vand.u32 4294901760, %v5023_v26 }
 0x3b0   :  { %v5037_v3 = vand.u32 4294901760, %v985_v33 }
 0x3b1   :  { %3113 = vmatpush.msrb.mxu2 %v3086_v57  ;;  %v5009_v8 = vsub.f32 %v981_v16, %v5004_v19  ;;  %v3087_v11 = vand.u32 4294901760, %v3086_v57  ;;  %v3386_v12 = vsub.f32 %v5023_v26, %v3385_v55 }
 0x3b2   :  { %v4206_v56 = vpop.eup %4205  ;;  %v5046_v58 = vsub.f32 %v985_v33, %v5037_v3 }
 0x3b3   :  { %v2386_v49 = vmul.f32 %v4206_v56, %v2315_v41  ;;  %3209 = vmatpush.msra.mxu2 %v5004_v19  ;;  %3162 = vmatpush.msra.mxu0 %v3087_v11  ;;  %v3088_v1 = vsub.f32 %v3086_v57, %v3087_v11  ;;  %v3236_v14 = vand.u32 4294901760, %v5009_v8  ;;  %vm2391_vm6 = vweird.f32 %v4206_v56 }
 0x3b4   :  { %vm2392_vm8 = vmor %vm2390_vm7, %vm2391_vm6  ;;  %v3387_v40 = vand.u32 4294901760, %v3386_v12 }
 0x3b5   :  { %v2387_v63 = vsub.f32 1.0, %v2386_v49  ;;  %v3089_v20 = vand.u32 4294901760, %v3088_v1  ;;  %v3237_v13 = vsub.f32 %v5009_v8, %v3236_v14 }
 0x3b7   :  { %v2388_v53 = vmul.f32 %v4206_v56, %v2387_v63  ;;  %v2318_v62 = vpop.xlane.xlu0 %2317  ;;  %3090 = vmatpush.msrb.mxu1 %v3089_v20  ;;  %v3238_v59 = vand.u32 4294901760, %v3237_v13 }
 0x3b8   :  { %4207 = vrcp.f32 %v2318_v62  ;;  %v2411_v22 = vand.u32 2147483648, %v2318_v62  ;;  %v2409_v30 = vand.u32 2147483647, %v2318_v62  ;;  %vm2405_vm11 = vweird.f32 %v2318_v62 }
 0x3b9   :  { %v2389_v46 = vadd.f32 %v4206_v56, %v2388_v53  ;;  %3184 = vmatpush.msra.mxu1 %v3059_v51  ;;  %3239 = vmatpush.msra.mxu3 %v3238_v59 }
 0x3ba   :  { %v2412_v6 = vor.u32 1.1754944e-38, %v2411_v22  ;;  %vm2410_vm13 = vcmp.eq.f32.partialorder %v2409_v30, 8.507059e+37 }
 0x3bb   :  { %v2393_v31 = vsel %vm2392_vm8, %v4206_v56, %v2389_v46 }
 0x3bc   :  { %v2398_v44 = vsel %vm2395_vm9, %v2397_v48, %v2393_v31  ;;  %vm3886_vm9 = vcmask 195584  }
 0x3bd   :  { %v2399_v24 = vmul.f32 %v4911_v45, %v2398_v44 }
 0x3be   :  { %v4208_v25 = vpop.eup %4207 }
 0x3bf   :  { %v2401_v42 = vmul.f32 %v4208_v25, %v2318_v62  ;;  %v3042_v29 = vsel %vm986_vm2, %v2399_v24, 0  ;;  %vm2406_vm10 = vweird.f32 %v4208_v25 }
 0x3c0   :  { %v3061_v0 = vand.u32 4294901760, %v3042_v29  ;;  %vm2407_vm12 = vmor %vm2405_vm11, %vm2406_vm10 }
 0x3c1   :  { %v2402_v47 = vsub.f32 1.0, %v2401_v42 }
 0x3c2   :  { %3092 = vmatmul.f32.vlgmr.msrb.gmra.mxu1 %v3061_v0  ;;  %v3062_v45 = vsub.f32 %v3042_v29, %v3061_v0 }
 0x3c3   :  { %v2403_v54 = vmul.f32 %v4208_v25, %v2402_v47  ;;  %3285 = vmatpush.msrb.mxu1 %v5004_v19  ;;  %v2321_v15 = vpop.xlane.xlu1 %2320 }
 0x3c4   :  { %4209 = vrcp.f32 %v2321_v15  ;;  %3116 = vmatmul.f32.vlgmr.msrb.gmra.mxu2 %v3062_v45  ;;  %v3063_v34 = vand.u32 4294901760, %v3062_v45  ;;  %v2426_v56 = vand.u32 2147483648, %v2321_v15  ;;  %vm2420_vm15 = vweird.f32 %v2321_v15 }
 0x3c5   :  { %v2404_v28 = vadd.f32 %v4208_v25, %v2403_v54  ;;  %3311 = vmatpush.msrb.mxu2 %v3236_v14 }
 0x3c6   :  { %3140 = vmatmul.f32.vlgmr.msrb.gmra.mxu3 %v3063_v34  ;;  %v3064_v38 = vsub.f32 %v3062_v45, %v3063_v34  ;;  %v2427_v63 = vor.u32 1.1754944e-38, %v2426_v56 }
 0x3c7   :  { %v2408_v37 = vsel %vm2407_vm12, %v4208_v25, %v2404_v28  ;;  %3333 = vmatpush.msrb.mxu3 %v5004_v19  ;;  %v3534_v19 = vand.u32 4294901760, %v5046_v58 }
 0x3c8   :  { %v2413_v41 = vsel %vm2410_vm13, %v2412_v6, %v2408_v37  ;;  %v3065_v43 = vand.u32 4294901760, %v3064_v38 }
 0x3c9   :  { %v2414_v4 = vmul.f32 %v4916_v17, %v2413_v41  ;;  %v2424_v17 = vand.u32 2147483647, %v2321_v15 }
 0x3ca   :  { %v4210_v27 = vpop.eup %4209  ;;  %3186 = vmatmul.f32.vlgmr.msra.gmra.mxu1 %v3061_v0  ;;  %3066 = vmatmul.f32.vlgmr.msrb.gmra.mxu0 %v3065_v43 }
 0x3cb   :  { %v2416_v36 = vmul.f32 %v4210_v27, %v2321_v15  ;;  %3388 = vmatpush.msra.mxu1 %v3387_v40  ;;  %v3191_v10 = vsel %vm986_vm2, %v2414_v4, 0  ;;  %3262 = vmatpush.msrb.mxu0 %v5009_v8  ;;  %vm2421_vm14 = vweird.f32 %v4210_v27  ;;  %v3535_v8 = vsub.f32 %v5046_v58, %v3534_v19 }
 0x3cc   :  { %v3210_v51 = vand.u32 4294901760, %v3191_v10  ;;  %vm2422_vm3 = vmor %vm2420_vm15, %vm2421_vm14  ;;  %vm2425_vm4 = vcmp.eq.f32.partialorder %v2424_v17, 8.507059e+37 }
 0x3cd   :  { %v2417_v16 = vsub.f32 1.0, %v2416_v36  ;;  %v3536_v62 = vand.u32 4294901760, %v3535_v8 }
 0x3ce   :  { %v3211_v57 = vsub.f32 %v3191_v10, %v3210_v51  ;;  %3241 = vmatmul.f32.vlgmr.msra.gmra.mxu3 %v3210_v51 }
 0x3cf   :  { %v2418_v5 = vmul.f32 %v4210_v27, %v2417_v16  ;;  %v2324_v7 = vpop.xlane.xlu2 %2323  ;;  %3434 = vmatpush.msra.mxu3 %v5019_v52 }
 0x3d0   :  { %4211 = vrcp.f32 %v2324_v7  ;;  %v3212_v11 = vand.u32 4294901760, %v3211_v57  ;;  %v2441_v48 = vand.u32 2147483648, %v2324_v7  ;;  %vm2435_vm6 = vweird.f32 %v2324_v7 }
 0x3d1   :  { %v2419_v49 = vadd.f32 %v4210_v27, %v2418_v5 }
 0x3d2   :  { %3164 = vmatmul.f32.vlgmr.msra.gmra.mxu0 %v3061_v0  ;;  %3289 = vmatmul.f32.vlgmr.msrb.gmra.mxu1 %v3212_v11  ;;  %v3213_v1 = vsub.f32 %v3211_v57, %v3212_v11  ;;  %v2442_v24 = vor.u32 1.1754944e-38, %v2441_v48 }
 0x3d3   :  { %v2423_v60 = vsel %vm2422_vm3, %v4210_v27, %v2419_v49  ;;  %3358 = vmatpush.msra.mxu0 %v5019_v52  ;;  %3482 = vmatpush.msrb.mxu1 %v5019_v52  ;;  %v2439_v52 = vand.u32 2147483647, %v2324_v7 }
 0x3d4   :  { %v2428_v14 = vsel %vm2425_vm4, %v2427_v63, %v2423_v60  ;;  %v3214_v21 = vand.u32 4294901760, %v3213_v1 }
 0x3d5   :  { %v2429_v53 = vmul.f32 %v4921_v2, %v2428_v14  ;;  %vm2440_vm8 = vcmp.eq.f32.partialorder %v2439_v52, 8.507059e+37 }
 0x3d6   :  { %v4212_v32 = vpop.eup %4211  ;;  %3215 = vmatmul.f32.vlgmr.msra.gmra.mxu2 %v3214_v21  ;;  %3335 = vmatmul.f32.vlgmr.msrb.gmra.mxu3 %v3210_v51 }
 0x3d7   :  { %v2431_v61 = vmul.f32 %v4212_v32, %v2324_v7  ;;  %v3340_v20 = vsel %vm986_vm2, %v2429_v53, 0  ;;  %3411 = vmatpush.msra.mxu2 %v5023_v26  ;;  %3537 = vmatpush.msrb.mxu3 %v3536_v62  ;;  %vm2436_vm5 = vweird.f32 %v4212_v32 }
 0x3d8   :  { %v3359_v46 = vand.u32 4294901760, %v3340_v20  ;;  %vm2437_vm7 = vmor %vm2435_vm6, %vm2436_vm5 }
 0x3d9   :  { %v2432_v13 = vsub.f32 1.0, %v2431_v61 }
 0x3da   :  { %v3360_v31 = vsub.f32 %v3340_v20, %v3359_v46  ;;  %3265 = vmatmul.f32.vlgmr.msrb.gmra.mxu0 %v3211_v57  ;;  %3390 = vmatmul.f32.vlgmr.msra.gmra.mxu1 %v3359_v46 }
 0x3db   :  { %v2433_v59 = vmul.f32 %v4212_v32, %v2432_v13  ;;  %3460 = vmatpush.msrb.mxu0 %v3385_v55  ;;  %3583 = vmatpush.msra.mxu1 %v5037_v3 }
 0x3dc   :  { %v3361_v2 = vand.u32 4294901760, %v3360_v31 }
 0x3dd   :  { %v2434_v44 = vadd.f32 %v4212_v32, %v2433_v59 }
 0x3de   :  { %v3362_v25 = vsub.f32 %v3360_v31, %v3361_v2  ;;  %3313 = vmatmul.f32.vlgmr.msrb.gmra.mxu2 %v3210_v51  ;;  %3438 = vmatmul.f32.vlgmr.msra.gmra.mxu3 %v3361_v2 }
 0x3df   :  { %v2438_v42 = vsel %vm2437_vm7, %v4212_v32, %v2434_v44  ;;  %3507 = vmatpush.msrb.mxu2 %v5037_v3  ;;  %3631 = vmatpush.msra.mxu3 %v5037_v3  ;;  %v2497_v54 = vpop.f32.mrf.mxu1 }
 0x3e0   :  { %v2443_v29 = vsel %vm2440_vm8, %v2442_v24, %v2438_v42  ;;  %v3363_v50 = vand.u32 4294901760, %v3362_v25 }
 0x3e1   :  { %v2444_v26 = vmul.f32 %v4929_v18, %v2443_v29 }
 0x3e2   :  { %3364 = vmatmul.f32.vlgmr.msra.gmra.mxu0 %v3363_v50  ;;  %3484 = vmatmul.f32.vlgmr.msrb.gmra.mxu1 %v3359_v46 }
 0x3e3   :  { %v3489_v35 = vsel %vm986_vm2, %v2444_v26, 0  ;;  %3560 = vmatpush.msra.mxu0 %v5046_v58 }
 0x3e4   :  { %v3508_v0 = vand.u32 4294901760, %v3489_v35 }
 0x3e6   :  { %v3509_v47 = vsub.f32 %v3489_v35, %v3508_v0  ;;  %3414 = vmatmul.f32.vlgmr.msra.gmra.mxu2 %v3360_v31  ;;  %3539 = vmatmul.f32.vlgmr.msrb.gmra.mxu3 %v3508_v0 }
 0x3e7   :  { %3609 = vmatpush.msra.mxu2 %v3534_v19  ;;  %v2471_v18 = vpop.f32.mrf.mxu0  ;;  %v2521_v30 = vpop.f32.mrf.mxu2 }
 0x3e8   :  { %v3510_v55 = vand.u32 4294901760, %v3509_v47  ;;  %v2591_v28 = vpop.f32.mrf.mxu1  ;;  %v2498_v40 = vadd.f32 %v2497_v54, %v2471_v18 }
 0x3e9   :  { %v2545_v15 = vpop.f32.mrf.mxu3 }
 0x3ea   :  { %v3511_v22 = vsub.f32 %v3509_v47, %v3510_v55  ;;  %3462 = vmatmul.f32.vlgmr.msrb.gmra.mxu0 %v3359_v46  ;;  %3587 = vmatmul.f32.vlgmr.msra.gmra.mxu1 %v3510_v55  ;;  %v2522_v58 = vadd.f32 %v2521_v30, %v2498_v40 }
 0x3ec   :  { %v3512_v45 = vand.u32 4294901760, %v3511_v22  ;;  %v2546_v56 = vadd.f32 %v2545_v15, %v2522_v58 }
 0x3ee   :  { %3513 = vmatmul.f32.vlgmr.msrb.gmra.mxu2 %v3512_v45  ;;  %3633 = vmatmul.f32.vlgmr.msra.gmra.mxu3 %v3508_v0 }
 0x3ef   :  { %v2569_v33 = vpop.f32.mrf.mxu0 }
 0x3f0   :  { %v2694_v3 = vpop.f32.mrf.mxu1  ;;  %v2570_v57 = vadd.f32 %v2569_v33, %v2546_v56 }
 0x3f1   :  { %v2646_v12 = vpop.f32.mrf.mxu3 }
 0x3f2   :  { %3563 = vmatmul.f32.vlgmr.msra.gmra.mxu0 %v3509_v47  ;;  %v2592_v11 = vadd.f32 %v2591_v28, %v2570_v57 }
 0x3f4   :  { %v3639_v53 = vrot.slane %v2592_v11, 4 }
 0x3f6   :  { %3611 = vmatmul.f32.vlgmr.msra.gmra.mxu2 %v3508_v0 }
 0x3f7   :  { %v2670_v6 = vpop.f32.mrf.mxu0 }
 0x3f8   :  { %v2795_v41 = vpop.f32.mrf.mxu1 }
 0x3f9   :  { %v2620_v34 = vpop.f32.mrf.mxu2  ;;  %v2740_v38 = vpop.f32.mrf.mxu3 }
 0x3fa   :  { %v2647_v10 = vadd.f32 %v2646_v12, %v2620_v34 }
 0x3fc   :  { %v2671_v19 = vadd.f32 %v2670_v6, %v2647_v10 }
 0x3fe   :  { %v2695_v63 = vadd.f32 %v2694_v3, %v2671_v19 }
 0x3ff   :  { %v2769_v39 = vpop.f32.mrf.mxu0 }
 0x400   :  { %v2796_v4 = vadd.f32 %v2795_v41, %v2769_v39  ;;  %v2889_v17 = vpop.f32.mrf.mxu1 }
 0x401   :  { %v2718_v37 = vpop.f32.mrf.mxu2  ;;  %v2843_v36 = vpop.f32.mrf.mxu3 }
 0x402   :  { %v2719_v14 = vadd.f32 %v2718_v37, %v2695_v63 }
 0x404   :  { %v2741_v61 = vadd.f32 %v2740_v38, %v2719_v14 }
 0x406   :  { %v3651_v2 = vrot.slane %v2741_v61, 4 }
 0x407   :  { %v2867_v16 = vpop.f32.mrf.mxu0 }
 0x409   :  { %v2819_v43 = vpop.f32.mrf.mxu2 }
 0x40a   :  { %v2820_v27 = vadd.f32 %v2819_v43, %v2796_v4 }
 0x40c   :  { %v2844_v51 = vadd.f32 %v2843_v36, %v2820_v27 }
 0x40e   :  { %v2868_v5 = vadd.f32 %v2867_v16, %v2844_v51 }
 0x410   :  { %v2890_v8 = vadd.f32 %v2889_v17, %v2868_v5 }
 0x412   :  { %v2968_v1 = vpop.f32.mrf.mxu0  ;;  %v3637_v32 = vrot.slane %v2890_v8, 4  ;;  %v3640_v20 = vsel %vm278_vm1, %v2890_v8, %v3639_v53 }
 0x413   :  { %v3648_v59 = vperm.slane %v3640_v20, %v4369_v9 }
 0x414   :  { %v2992_v62 = vpop.f32.mrf.mxu1  ;;  %v3638_v48 = vsel %vm278_vm1, %v3637_v32, %v2592_v11 }
 0x415   :  { %v3644_v24 = vperm.slane %v3638_v48, %v4369_v9  ;;  %v3675_v29 = vrot.slane %v3648_v59, 4 }
 0x416   :  { %v2944_v7 = vpop.f32.mrf.mxu3 }
 0x417   :  { %v3663_v35 = vrot.slane %v3644_v24, 4 }
 0x41e   :  { %v2918_v49 = vpop.f32.mrf.mxu2  ;;  %v3038_v52 = vpop.f32.mrf.mxu3 }
 0x41f   :  { %v2945_v60 = vadd.f32 %v2944_v7, %v2918_v49 }
 0x421   :  { %v2969_v21 = vadd.f32 %v2968_v1, %v2945_v60 }
 0x423   :  { %v2993_v46 = vadd.f32 %v2992_v62, %v2969_v21 }
 0x426   :  { %v3016_v13 = vpop.f32.mrf.mxu2 }
 0x427   :  { %v3017_v31 = vadd.f32 %v3016_v13, %v2993_v46 }
 0x429   :  { %v3039_v44 = vadd.f32 %v3038_v52, %v3017_v31  ;;  %v4216_v52 = vld [vmem:[%s5209_s2] sm:$0xff] }
 0x42b   :  { %v3649_v25 = vrot.slane %v3039_v44, 4  ;;  %v3652_v42 = vsel %vm278_vm1, %v3039_v44, %v3651_v2 }
 0x42c   :  { %v3660_v50 = vperm.slane %v3652_v42, %v4369_v9 }
 0x42d   :  { %v3650_v26 = vsel %vm278_vm1, %v3649_v25, %v2741_v61 }
 0x42e   :  { %v3656_v0 = vperm.slane %v3650_v26, %v4369_v9  ;;  %v3673_v47 = vrot.slane %v3660_v50, 4  ;;  %v3676_v55 = vsel %vm278_vm1, %v3660_v50, %v3675_v29 }
 0x42f   :  { %v3684_v22 = vperm.slane %v3676_v55, %v4382_v23 }
 0x430   :  { %v3661_v45 = vrot.slane %v3656_v0, 4  ;;  %v3664_v18 = vsel %vm278_vm1, %v3656_v0, %v3663_v35  ;;  %v3674_v54 = vsel %vm278_vm1, %v3673_v47, %v3648_v59 }
 0x431   :  { %v3672_v30 = vperm.slane %v3664_v18, %v4382_v23  ;;  %v3680_v15 = vperm.slane %v3674_v54, %v4382_v23  ;;  %v3691_v33 = vrot.slane %v3684_v22, 4 }
 0x432   :  { %v3662_v28 = vsel %vm278_vm1, %v3661_v45, %v3644_v24 }
 0x433   :  { %v3668_v34 = vperm.slane %v3662_v28, %v4382_v23  ;;  %v3687_v12 = vrot.slane %v3672_v30, 4  ;;  %v3689_v6 = vrot.slane %v3680_v15, 4  ;;  %v3692_v3 = vsel %vm278_vm1, 0.0, %v3691_v33 }
 0x434   :  { %v3765_v37 = vrot.slane %v3692_v3, 4  ;;  %v3760_v38 = vsel %vm278_vm1, %v3691_v33, %v3680_v15 }
 0x435   :  { %v3685_v39 = vrot.slane %v3668_v34, 4  ;;  %v3688_v41 = vsel %vm278_vm1, 0.0, %v3687_v12  ;;  %v3690_v43 = vsel %vm278_vm1, 0.0, %v3689_v6  ;;  %v3749_v40 = vsel %vm278_vm1, %v3687_v12, %v3668_v34 }
 0x436   :  { %v3753_v4 = vperm.slane %v3749_v40, %v4369_v9  ;;  %v3754_v27 = vrot.slane %v3688_v41, 4  ;;  %v3764_v58 = vperm.slane %v3760_v38, %v4369_v9  ;;  %v3766_v36 = vsel %vm278_vm1, %v3765_v37, %v3690_v43 }
 0x437   :  { %v3686_v10 = vsel %vm278_vm1, 0.0, %v3685_v39  ;;  %v3770_v51 = vperm.slane %v3766_v36, %v4369_v9 }
 0x438   :  { %v3755_v16 = vsel %vm278_vm1, %v3754_v27, %v3686_v10  ;;  %v3773_v56 = vrot.slane %v3753_v4, 4  ;;  %v3785_v57 = vrot.slane %v3764_v58, 4 }
 0x439   :  { %v3759_v19 = vperm.slane %v3755_v16, %v4369_v9  ;;  %v3783_v5 = vrot.slane %v3770_v51, 4 }
 0x43a   :  { %v3786_v17 = vsel %vm278_vm1, %v3770_v51, %v3785_v57 }
 0x43b   :  { %v3774_v7 = vsel %vm278_vm1, %v3759_v19, %v3773_v56  ;;  %v3794_v49 = vperm.slane %v3786_v17, %v4382_v23  ;;  %v3771_v11 = vrot.slane %v3759_v19, 4  ;;  %v3784_v63 = vsel %vm278_vm1, %v3783_v5, %v3764_v58 }
 0x43c   :  { %v3782_v8 = vperm.slane %v3774_v7, %v4382_v23  ;;  %v3790_v60 = vperm.slane %v3784_v63, %v4382_v23  ;;  %v3900_v63 = vpop.permute.xlu0 %3899 }
 0x43d   :  { %v3799_v1 = vrot.slane %v3794_v49, 4  ;;  %v3772_v14 = vsel %vm278_vm1, %v3771_v11, %v3753_v4 }
 0x43e   :  { %v3801_v21 = vrot.slane %v3782_v8, 4  ;;  %v3778_v53 = vperm.slane %v3772_v14, %v4382_v23  ;;  %v3795_v32 = vrot.slane %v3790_v60, 4 }
 0x43f   :  { %v3800_v62 = vsel %vm278_vm1, %v3799_v1, %v3782_v8  ;;  %v3093_v46 = vpop.f32.mrf.mxu1  ;;  %v5122_v1 = vand.u32 4294901760, %v3900_v63 }
 0x440   :  { %3867 = vrot.lane.b32.xlu2 %v3800_v62, %s4252_s9  ;;  %v3802_v61 = vsel %vm278_vm1, %v3794_v49, %v3801_v21  ;;  %v5110_v20 = vsel %vm278_vm1, %v3795_v32, %v3778_v53  ;;  %v3797_v13 = vrot.slane %v3778_v53, 4 }
 0x441   :  { %3875 = vrot.lane.b32.xlu1 %v3802_v61, %s4253_s10  ;;  %v5127_v32 = vsub.f32 %v3900_v63, %v5122_v1  ;;  %4045 = vmatpush.msrb.mxu3 %v5122_v1 }
 0x442   :  { %v3798_v31 = vsel %vm278_vm1, %v3790_v60, %v3797_v13  ;;  %3928 = vmatpush.msrb.mxu0 %v5122_v1 }
 0x443   :  { %v3966_v13 = vand.u32 4294901760, %v5127_v32  ;;  %4011 = vmatpush.msrb.mxu2 %v5127_v32 }
 0x447   :  { %v3067_v48 = vpop.f32.mrf.mxu0  ;;  %v3187_v2 = vpop.f32.mrf.mxu1 }
 0x448   :  { %3893 = vrot.lane.b32.xlu2 %v4216_v52, %s4251_s30  ;;  %v3117_v24 = vpop.f32.mrf.mxu2  ;;  %v3094_v55 = vadd.f32 %v3093_v46, %v3067_v48 }
 0x449   :  { %v3141_v59 = vpop.f32.mrf.mxu3  ;;  %3859 = vrot.lane.b32.xlu1 %v3798_v31, %s4254_s13 }
 0x44a   :  { %v3118_v45 = vadd.f32 %v3117_v24, %v3094_v55 }
 0x44c   :  { %v3142_v28 = vadd.f32 %v3141_v59, %v3118_v45 }
 0x44f   :  { %v3165_v44 = vpop.f32.mrf.mxu0  ;;  %v3290_v29 = vpop.f32.mrf.mxu1 }
 0x450   :  { %v3166_v6 = vadd.f32 %v3165_v44, %v3142_v28  ;;  %v3967_v44 = vsub.f32 %v5127_v32, %v3966_v13 }
 0x451   :  { %v3242_v25 = vpop.f32.mrf.mxu3 }
 0x452   :  { %v3188_v41 = vadd.f32 %v3187_v2, %v3166_v6 }
 0x454   :  { %v3695_v10 = vrot.slane %v3188_v41, 4 }
 0x457   :  { %v3266_v42 = vpop.f32.mrf.mxu0  ;;  %v3391_v47 = vpop.f32.mrf.mxu1 }
 0x459   :  { %v3216_v50 = vpop.f32.mrf.mxu2  ;;  %v3336_v26 = vpop.f32.mrf.mxu3 }
 0x45a   :  { %v3243_v15 = vadd.f32 %v3242_v25, %v3216_v50 }
 0x45c   :  { %v3267_v3 = vadd.f32 %v3266_v42, %v3243_v15 }
 0x45e   :  { %v3291_v43 = vadd.f32 %v3290_v29, %v3267_v3 }
 0x45f   :  { %v3365_v35 = vpop.f32.mrf.mxu0  ;;  %v3485_v12 = vpop.f32.mrf.mxu1 }
 0x460   :  { %v3392_v18 = vadd.f32 %v3391_v47, %v3365_v35  ;;  %v3968_v35 = vand.u32 4294901760, %v3967_v44 }
 0x461   :  { %v3314_v0 = vpop.f32.mrf.mxu2  ;;  %v3439_v22 = vpop.f32.mrf.mxu3 }
 0x462   :  { %v3315_v58 = vadd.f32 %v3314_v0, %v3291_v43  ;;  %v3898_v0 = vpop.permute.xlu0 %3897  ;;  %3969 = vmatpush.msrb.mxu1 %v3968_v35 }
 0x463   :  { %v5146_v55 = vand.u32 4294901760, %v3898_v0 }
 0x464   :  { %v3337_v56 = vadd.f32 %v3336_v26, %v3315_v58 }
 0x465   :  { %4047 = vmatpush.msrb.mxu3 %v5146_v55  ;;  %3930 = vmatpush.msrb.mxu0 %v5146_v55 }
 0x466   :  { %v3707_v8 = vrot.slane %v3337_v56, 4 }
 0x467   :  { %v3463_v54 = vpop.f32.mrf.mxu0  ;;  %v3588_v16 = vpop.f32.mrf.mxu1 }
 0x469   :  { %v3415_v30 = vpop.f32.mrf.mxu2  ;;  %v3540_v38 = vpop.f32.mrf.mxu3 }
 0x46a   :  { %v3416_v33 = vadd.f32 %v3415_v30, %v3392_v18 }
 0x46c   :  { %v3440_v34 = vadd.f32 %v3439_v22, %v3416_v33  ;;  %v5152_v33 = vsub.f32 %v3898_v0, %v5146_v55 }
 0x46e   :  { %v3464_v37 = vadd.f32 %v3463_v54, %v3440_v34  ;;  %4014 = vmatpush.msrb.mxu2 %v5152_v33 }
 0x46f   :  { %v3564_v27 = vpop.f32.mrf.mxu0 }
 0x470   :  { %v3486_v40 = vadd.f32 %v3485_v12, %v3464_v37 }
 0x471   :  { %v3514_v39 = vpop.f32.mrf.mxu2  ;;  %v3634_v11 = vpop.f32.mrf.mxu3 }
 0x472   :  { %v3541_v4 = vadd.f32 %v3540_v38, %v3514_v39  ;;  %v3693_v51 = vrot.slane %v3486_v40, 4  ;;  %v3696_v57 = vsel %vm278_vm1, %v3486_v40, %v3695_v10 }
 0x473   :  { %v3704_v49 = vperm.slane %v3696_v57, %v4369_v9 }
 0x474   :  { %v3565_v36 = vadd.f32 %v3564_v27, %v3541_v4  ;;  %v3694_v17 = vsel %vm278_vm1, %v3693_v51, %v3188_v41 }
 0x475   :  { %v3700_v14 = vperm.slane %v3694_v17, %v4369_v9  ;;  %v3731_v62 = vrot.slane %v3704_v49, 4 }
 0x476   :  { %v3589_v19 = vadd.f32 %v3588_v16, %v3565_v36 }
 0x477   :  { %v3719_v48 = vrot.slane %v3700_v14, 4 }
 0x479   :  { %v3612_v5 = vpop.f32.mrf.mxu2 }
 0x47a   :  { %v3613_v7 = vadd.f32 %v3612_v5, %v3589_v19 }
 0x47c   :  { %v3635_v60 = vadd.f32 %v3634_v11, %v3613_v7 }
 0x47e   :  { %v3705_v21 = vrot.slane %v3635_v60, 4  ;;  %v3708_v53 = vsel %vm278_vm1, %v3635_v60, %v3707_v8 }
 0x47f   :  { %v3716_v61 = vperm.slane %v3708_v53, %v4369_v9 }
 0x480   :  { %v3706_v46 = vsel %vm278_vm1, %v3705_v21, %v3337_v56  ;;  %v3896_v21 = vpop.permute.xlu0 %3895 }
 0x481   :  { %v3712_v31 = vperm.slane %v3706_v46, %v4369_v9  ;;  %v3729_v59 = vrot.slane %v3716_v61, 4  ;;  %v3732_v52 = vsel %vm278_vm1, %v3716_v61, %v3731_v62  ;;  %v3931_v62 = vand.u32 4294901760, %v3896_v21 }
 0x482   :  { %v3740_v2 = vperm.slane %v3732_v52, %v4382_v23  ;;  %v3972_v46 = vand.u32 4294901760, %v5152_v33 }
 0x483   :  { %v3717_v24 = vrot.slane %v3712_v31, 4  ;;  %v3720_v25 = vsel %vm278_vm1, %v3712_v31, %v3719_v48  ;;  %v3730_v42 = vsel %vm278_vm1, %v3729_v59, %v3704_v49  ;;  %v3977_v61 = vsub.f32 %v3896_v21, %v3931_v62  ;;  %4049 = vmatpush.msrb.mxu3 %v3931_v62  ;;  %3932 = vmatpush.msrb.mxu0 %v3931_v62  ;;  %v4217_v48 = vld [vmem:[%s5209_s2 + $0x20] ss:$0 sm:$0xff] }
 0x484   :  { %v3728_v29 = vperm.slane %v3720_v25, %v4382_v23  ;;  %v3736_v50 = vperm.slane %v3730_v42, %v4382_v23  ;;  %v3747_v26 = vrot.slane %v3740_v2, 4  ;;  %v3973_v59 = vsub.f32 %v5152_v33, %v3972_v46 }
 0x485   :  { %v3718_v47 = vsel %vm278_vm1, %v3717_v24, %v3700_v14  ;;  %4017 = vmatpush.msrb.mxu2 %v3977_v61  ;;  %v3978_v31 = vand.u32 4294901760, %v3977_v61 }
 0x486   :  { %v3724_v22 = vperm.slane %v3718_v47, %v4382_v23  ;;  %v3743_v45 = vrot.slane %v3728_v29, 4  ;;  %v3745_v18 = vrot.slane %v3736_v50, 4  ;;  %v3748_v54 = vsel %vm278_vm1, 0.0, %v3747_v26 }
 0x487   :  { %v3819_v30 = vrot.slane %v3748_v54, 4  ;;  %v3814_v15 = vsel %vm278_vm1, %v3747_v26, %v3736_v50  ;;  %v3979_v2 = vsub.f32 %v3977_v61, %v3978_v31  ;;  %v3974_v24 = vand.u32 4294901760, %v3973_v59 }
 0x488   :  { %v3741_v28 = vrot.slane %v3724_v22, 4  ;;  %v3744_v34 = vsel %vm278_vm1, 0.0, %v3743_v45  ;;  %v3746_v12 = vsel %vm278_vm1, 0.0, %v3745_v18  ;;  %v3803_v6 = vsel %vm278_vm1, %v3743_v45, %v3724_v22 }
 0x489   :  { %v3807_v3 = vperm.slane %v3803_v6, %v4369_v9  ;;  %v3808_v37 = vrot.slane %v3744_v34, 4  ;;  %v3818_v38 = vperm.slane %v3814_v15, %v4369_v9  ;;  %v3820_v39 = vsel %vm278_vm1, %v3819_v30, %v3746_v12  ;;  %3975 = vmatpush.msrb.mxu1 %v3974_v24 }
 0x48a   :  { %v3742_v41 = vsel %vm278_vm1, 0.0, %v3741_v28  ;;  %v3824_v43 = vperm.slane %v3820_v39, %v4369_v9  ;;  %v3980_v25 = vand.u32 4294901760, %v3979_v2 }
 0x48b   :  { %v3809_v40 = vsel %vm278_vm1, %v3808_v37, %v3742_v41  ;;  %v3827_v4 = vrot.slane %v3807_v3, 4  ;;  %v3839_v27 = vrot.slane %v3818_v38, 4 }
 0x48c   :  { %v3813_v58 = vperm.slane %v3809_v40, %v4369_v9  ;;  %v3837_v36 = vrot.slane %v3824_v43, 4  ;;  %3981 = vmatpush.msrb.mxu1 %v3980_v25 }
 0x48d   :  { %v3840_v10 = vsel %vm278_vm1, %v3824_v43, %v3839_v27 }
 0x48e   :  { %v3828_v51 = vsel %vm278_vm1, %v3813_v58, %v3827_v4  ;;  %v3848_v16 = vperm.slane %v3840_v10, %v4382_v23  ;;  %v3825_v56 = vrot.slane %v3813_v58, 4  ;;  %v3838_v57 = vsel %vm278_vm1, %v3837_v36, %v3818_v38 }
 0x48f   :  { %v3836_v19 = vperm.slane %v3828_v51, %v4382_v23  ;;  %v3844_v5 = vperm.slane %v3838_v57, %v4382_v23 }
 0x490   :  { %v3853_v17 = vrot.slane %v3848_v16, 4  ;;  %v3826_v7 = vsel %vm278_vm1, %v3825_v56, %v3807_v3 }
 0x491   :  { %v3855_v49 = vrot.slane %v3836_v19, 4  ;;  %v3832_v9 = vperm.slane %v3826_v7, %v4382_v23  ;;  %v3849_v11 = vrot.slane %v3844_v5, 4 }
 0x492   :  { %v3854_v63 = vsel %vm278_vm1, %v3853_v17, %v3836_v19 }
 0x493   :  { %3869 = vrot.lane.b32.xlu0 %v3854_v63, %s4252_s9  ;;  %v3856_v8 = vsel %vm278_vm1, %v3848_v16, %v3855_v49  ;;  %v3851_v60 = vrot.slane %v3832_v9, 4  ;;  %v3850_v14 = vsel %vm278_vm1, %v3849_v11, %v3832_v9 }
 0x494   :  { %3877 = vrot.lane.b32.xlu2 %v3856_v8, %s4253_s10 }
 0x495   :  { %v3852_v53 = vsel %vm278_vm1, %v3844_v5, %v3851_v60  ;;  %vm3883_vm1 = vcmask 130048  }
 0x496   :  { %3861 = vrot.lane.b32.xlu1 %v3852_v53, %s4254_s13 }
 0x49a   :  { %v3868_v23 = vpop.permute.xlu2 %3867 }
 0x49e   :  { %3906 = vrot.lane.b32.xlu1 %v4217_v48, %s4251_s30 }
 0x4a2   :  { %v3894_v52 = vpop.permute.xlu2 %3893 }
 0x4a3   :  { %v3933_v44 = vand.u32 4294901760, %v3894_v52 }
 0x4a5   :  { %v3983_v42 = vsub.f32 %v3894_v52, %v3933_v44  ;;  %4051 = vmatpush.msrb.mxu3 %v3933_v44  ;;  %3934 = vmatpush.msrb.mxu0 %v3933_v44 }
 0x4a7   :  { %v3984_v29 = vand.u32 4294901760, %v3983_v42  ;;  %4020 = vmatpush.msrb.mxu2 %v3983_v42  ;;  %4080 = vmatpush.msra.mxu0 %v3966_v13 }
 0x4a9   :  { %v3985_v50 = vsub.f32 %v3983_v42, %v3984_v29  ;;  %4084 = vmatpush.msra.mxu0 %v3972_v46 }
 0x4ab   :  { %v3986_v26 = vand.u32 4294901760, %v3985_v50  ;;  %4088 = vmatpush.msra.mxu0 %v3978_v31 }
 0x4ad   :  { %3987 = vmatpush.msrb.mxu1 %v3986_v26  ;;  %4092 = vmatpush.msra.mxu0 %v3984_v29 }
 0x4af   :  { %4115 = vmatpush.msra.mxu1 %v5122_v1 }
 0x4b1   :  { %4117 = vmatpush.msra.mxu1 %v5146_v55 }
 0x4b3   :  { %4119 = vmatpush.msra.mxu1 %v3931_v62  ;;  %v3876_v35 = vpop.permute.xlu1 %3875 }
 0x4b5   :  { %4121 = vmatpush.msra.mxu1 %v3933_v44 }
 0x4bb   :  { %v3860_v0 = vpop.permute.xlu1 %3859 }
 0x4bc   :  { %v3881_v32 = vsel %vm986_vm2, %v5110_v20, %v3860_v0 }
 0x4bd   :  { %v3884_v13 = vsel %vm3883_vm1, %v3881_v32, %v3868_v23 }
 0x4be   :  { %v3887_v47 = vsel %vm3886_vm9, %v3884_v13, %v3876_v35 }
 0x4bf   :  { %v3910_v22 = vsel %vm34_vm0, %v3887_v47, 0 }
 0x4c0   :  { %v3935_v45 = vand.u32 4294901760, %v3910_v22 }
 0x4c2   :  { %v3936_v1 = vsub.f32 %v3910_v22, %v3935_v45  ;;  %3989 = vmatmul.f32.vlgmr.msrb.gmra.mxu1 %v3935_v45 }
 0x4c4   :  { %4023 = vmatmul.f32.vlgmr.msrb.gmra.mxu2 %v3936_v1  ;;  %v3937_v55 = vand.u32 4294901760, %v3936_v1 }
 0x4c6   :  { %4055 = vmatmul.f32.vlgmr.msrb.gmra.mxu3 %v3937_v55  ;;  %v3938_v18 = vsub.f32 %v3936_v1, %v3937_v55 }
 0x4c8   :  { %v3939_v54 = vand.u32 4294901760, %v3938_v18 }
 0x4ca   :  { %3940 = vmatmul.f32.vlgmr.msrb.gmra.mxu0 %v3939_v54 }
 0x4ee   :  { %v3878_v20 = vpop.permute.xlu2 %3877 }
 0x505   :  { %v3870_v15 = vpop.permute.xlu0 %3869 }
 0x508   :  { %v3862_v30 = vpop.permute.xlu1 %3861 }
 0x509   :  { %v3882_v33 = vsel %vm986_vm2, %v3850_v14, %v3862_v30 }
 0x50a   :  { %v3885_v28 = vsel %vm3883_vm1, %v3882_v33, %v3870_v15 }
 0x50b   :  { %v3888_v34 = vsel %vm3886_vm9, %v3885_v28, %v3878_v20 }
 0x50c   :  { %v3913_v12 = vsel %vm34_vm0, %v3888_v34, 0 }
 0x50d   :  { %v3943_v6 = vand.u32 4294901760, %v3913_v12 }
 0x50f   :  { %3993 = vmatmul.f32.gmra.mxu1 %v3943_v6  ;;  %v3944_v3 = vsub.f32 %v3913_v12, %v3943_v6 }
 0x510   :  { %v3907_v43 = vpop.permute.xlu1 %3906 }
 0x511   :  { %4028 = vmatmul.f32.gmra.mxu2 %v3944_v3  ;;  %v3945_v37 = vand.u32 4294901760, %v3944_v3 }
 0x513   :  { %4061 = vmatmul.f32.gmra.mxu3 %v3945_v37  ;;  %v3946_v38 = vsub.f32 %v3944_v3, %v3945_v37 }
 0x515   :  { %v3947_v39 = vand.u32 4294901760, %v3946_v38 }
 0x517   :  { %3948 = vmatmul.f32.gmra.mxu0 %v3947_v39  ;;  %4123 = vmatmul.f32.vlgmr.msra.gmra.mxu1 %v3935_v45 }
 0x51f   :  { %4094 = vmatmul.f32.vlgmr.msra.gmra.mxu0 %v3935_v45  ;;  %4127 = vmatmul.f32.gmra.mxu1 %v3943_v6 }
 0x527   :  { %4098 = vmatmul.f32.gmra.mxu0 %v3943_v6 }
 0x53f   :  { %v3990_v41 = vpop.f32.mrf.mxu1 }
 0x547   :  { %v3941_v40 = vpop.f32.mrf.mxu0  ;;  %v4024_v10 = vpop.f32.mrf.mxu2 }
 0x548   :  { %v3942_v4 = vadd.f32 %v3941_v40, %v3907_v43 }
 0x549   :  { %v4056_v56 = vpop.f32.mrf.mxu3 }
 0x54a   :  { %v3991_v58 = vadd.f32 %v3990_v41, %v3942_v4 }
 0x54c   :  { %v4025_v51 = vadd.f32 %v4024_v10, %v3991_v58 }
 0x54e   :  { %v4057_v57 = vadd.f32 %v4056_v56, %v4025_v51 }
 0x58c   :  { %v3994_v27 = vpop.f32.mrf.mxu1 }
 0x594   :  { %v3949_v36 = vpop.f32.mrf.mxu0  ;;  %v4124_v5 = vpop.f32.mrf.mxu1 }
 0x595   :  { %v3950_v16 = vadd.f32 %v3949_v36, %v3907_v43  ;;  %v4029_v49 = vpop.f32.mrf.mxu2 }
 0x596   :  { %v4062_v63 = vpop.f32.mrf.mxu3 }
 0x597   :  { %v3995_v19 = vadd.f32 %v3994_v27, %v3950_v16 }
 0x599   :  { %v4030_v9 = vadd.f32 %v4029_v49, %v3995_v19 }
 0x59b   :  { %v4063_v8 = vadd.f32 %v4062_v63, %v4030_v9 }
 0x59c   :  { %v4095_v17 = vpop.f32.mrf.mxu0  ;;  %v4128_v21 = vpop.f32.mrf.mxu1 }
 0x59d   :  { %v4096_v7 = vadd.f32 %v4095_v17, %v4057_v57 }
 0x59f   :  { %v4125_v11 = vadd.f32 %v4124_v5, %v4096_v7 }
 0x5a1   :  { %4131 = vst.msk [vmem:[#allocation2] sm:$0xff] %vm34_vm0, %v4125_v11 }
 0x5a4   :  { %v4099_v60 = vpop.f32.mrf.mxu0 }
 0x5a5   :  { %v4100_v14 = vadd.f32 %v4099_v60, %v4063_v8 }
 0x5a7   :  { %v4129_v53 = vadd.f32 %v4128_v21, %v4100_v14 }
 0x5a9   :  { %4132 = vst.msk [vmem:[#allocation2 + $0x8] sm:$0xff] %vm34_vm0, %v4129_v53 }
 0x5aa   :  { %4145 = dma.vmem_to_hbm [thread:$0]  %s4138_s19, 256, %s4140_s17, [#allocation3], %s4256_s20, %s4256_s20, %s4254_s13  }
 0x5ab   :  { %4242 = dma.done.wait [#allocation3], 256  }
 0x5ac   :  { %4243 = vsyncadd [#allocation3], 4294967040 }
 0x5ad   :  { %4150 = vsyncpa [#allocation3], 1 }

</bundles_post_ra>
